<compile_context>
chip_gen: v5e
topology: v5e:2x2
jax: 0.10.0
libtpu: 0.0.40
codegen_flags: <defaults>
</compile_context>

<pallas_src>
import jax
import jax.numpy as jnp
import numpy as np
from jax import lax
from jax.experimental import pallas as pl
from jax.experimental.pallas import tpu as pltpu


# ----------------------------- Pallas kernel ------------------------------ #
def _make_encoder_kernel(num_layers, hidden_size, seq_len, batch_pad):
    """LSTM-stack + Linear kernel specialized for static sizes.

    Gate column order inside the kernel is (i, f, o, g) — the wrapper reorders
    the PyTorch (i, f, g, o) weights/bias accordingly.
    """
    L, H, T, B = num_layers, hidden_size, seq_len, batch_pad

    def kernel(x_ref, *refs):
        # ref order after x_ref (T*B, D_in):
        #   inputs : [wiT_l (D_l,4H), whT_l (H,4H), b_l (1,4H)] * L,
        #            wlatT (H, LAT_PAD), blat (1, LAT_PAD)
        #   outputs: out_ref (B, LAT_PAD)
        #   scratch: gx_ref (T*B, 4H) f32, seq_ref (T*B, H) f32
        layer_refs = refs[:3 * L]
        wlat_ref = refs[3 * L]
        blat_ref = refs[3 * L + 1]
        out_ref = refs[3 * L + 2]
        gx_ref = refs[3 * L + 3]
        seq_ref = refs[3 * L + 4]

        h_last = None
        for l in range(L):                    # static layer loop
            wiT = layer_refs[3 * l][...]      # (D_l, 4H)
            whT = layer_refs[3 * l + 1][...]  # (H, 4H)
            bias = layer_refs[3 * l + 2][...]  # (1, 4H)

            # One batched input projection for the whole sequence; result goes
            # to VMEM scratch so vreg pressure stays bounded as T grows.
            src = x_ref[...] if l == 0 else seq_ref[...]
            gx_ref[...] = (
                jnp.dot(src, wiT, preferred_element_type=jnp.float32) + bias
            )                                  # (T*B, 4H)

            write_seq = l < L - 1              # static flag per layer

            def step(t, carry):
                h, c = carry
                off = pl.multiple_of(t * B, B)             # sublane-aligned
                g = gx_ref[pl.ds(off, B), :] + jnp.dot(
                    h, whT, preferred_element_type=jnp.float32)  # (B, 4H)
                sig = jax.nn.sigmoid(g[:, :3 * H])          # i | f | o
                g_g = jnp.tanh(g[:, 3 * H:])                # candidate
                i_g = sig[:, 0 * H:1 * H]
                f_g = sig[:, 1 * H:2 * H]
                o_g = sig[:, 2 * H:3 * H]
                c_new = f_g * c + i_g * g_g
                h_new = o_g * jnp.tanh(c_new)
                if write_seq:                               # next-layer input
                    seq_ref[pl.ds(off, B), :] = h_new
                return (h_new, c_new)

            h0 = jnp.zeros((B, H), jnp.float32)
            c0 = jnp.zeros((B, H), jnp.float32)
            h_last, _ = lax.fori_loop(0, T, step, (h0, c0), unroll=True)

        # Final Linear (output lanes padded to a multiple of 128 -> dense vst).
        out_ref[...] = (
            jnp.dot(h_last, wlat_ref[...], preferred_element_type=jnp.float32)
            + blat_ref[...]
        )

    return kernel


# ------------------------------ JAX wrapper -------------------------------- #
def _reorder_gates(w):
    """Rows (i, f, g, o) -> (i, f, o, g) along the 4H axis (axis 0)."""
    i, f, g, o = jnp.split(w, 4, axis=0)
    return jnp.concatenate([i, f, o, g], axis=0)


def encoder_forward(x, params, *, hidden_size, latent_size, num_layers):
    """x: (batch, seq, input_size) float32 -> (batch, latent_size) float32."""
    B, T, D = x.shape
    B_pad = max(8, ((B + 7) // 8) * 8)                 # full sublane tile
    LAT_PAD = max(128, ((latent_size + 127) // 128) * 128)  # lane-dense output

    x_pad = jnp.pad(x.astype(jnp.float32), ((0, B_pad - B), (0, 0), (0, 0)))
    # time-major, flattened: rows [t*B_pad:(t+1)*B_pad] are timestep t.
    x_tm = jnp.transpose(x_pad, (1, 0, 2)).reshape(T * B_pad, D)

    kernel_inputs = [x_tm]
    for l in range(num_layers):
        w_ih, w_hh, b_ih, b_hh = params["lstm"][l]
        w_ih_r = _reorder_gates(w_ih.astype(jnp.float32))
        w_hh_r = _reorder_gates(w_hh.astype(jnp.float32))
        b_r = _reorder_gates((b_ih + b_hh).astype(jnp.float32))
        kernel_inputs.append(jnp.transpose(w_ih_r))          # (D_l, 4H)
        kernel_inputs.append(jnp.transpose(w_hh_r))          # (H, 4H)
        kernel_inputs.append(b_r.reshape(1, -1))             # (1, 4H)
    w_lat, b_lat = params["latent"]
    w_lat_t = jnp.transpose(w_lat).astype(jnp.float32)       # (H, latent)
    w_lat_p = jnp.pad(w_lat_t, ((0, 0), (0, LAT_PAD - latent_size)))
    b_lat_p = jnp.pad(b_lat.astype(jnp.float32).reshape(1, -1),
                      ((0, 0), (0, LAT_PAD - latent_size)))
    kernel_inputs.append(w_lat_p)                            # (H, LAT_PAD)
    kernel_inputs.append(b_lat_p)                            # (1, LAT_PAD)

    kernel = _make_encoder_kernel(num_layers, hidden_size, T, B_pad)

    vmem = pltpu.MemorySpace.VMEM
    out_pad = pl.pallas_call(
        kernel,
        out_shape=jax.ShapeDtypeStruct((B_pad, LAT_PAD), jnp.float32),
        in_specs=[pl.BlockSpec(memory_space=vmem) for _ in kernel_inputs],
        out_specs=pl.BlockSpec(memory_space=vmem),
        scratch_shapes=[
            pltpu.VMEM((T * B_pad, 4 * hidden_size), jnp.float32),  # gates_x
            pltpu.VMEM((T * B_pad, hidden_size), jnp.float32),      # layer outs
        ],
    )(*kernel_inputs)
    return out_pad[:B, :latent_size]


# ------------------------- parameter initialization ------------------------ #
def init_params(key, input_size, hidden_size, latent_size, num_layers):
    """Deterministic init mimicking PyTorch's uniform(-1/sqrt(H), 1/sqrt(H))."""
    params = {"lstm": [], "latent": None}
    k_lstm = 1.0 / np.sqrt(hidden_size)
    for l in range(num_layers):
        in_dim = input_size if l == 0 else hidden_size
        key, k1, k2, k3, k4 = jax.random.split(key, 5)
        w_ih = jax.random.uniform(k1, (4 * hidden_size, in_dim),
                                  minval=-k_lstm, maxval=k_lstm, dtype=jnp.float32)
        w_hh = jax.random.uniform(k2, (4 * hidden_size, hidden_size),
                                  minval=-k_lstm, maxval=k_lstm, dtype=jnp.float32)
        b_ih = jax.random.uniform(k3, (4 * hidden_size,),
                                  minval=-k_lstm, maxval=k_lstm, dtype=jnp.float32)
        b_hh = jax.random.uniform(k4, (4 * hidden_size,),
                                  minval=-k_lstm, maxval=k_lstm, dtype=jnp.float32)
        params["lstm"].append((w_ih, w_hh, b_ih, b_hh))
    k_lin = 1.0 / np.sqrt(hidden_size)
    key, k1, k2 = jax.random.split(key, 3)
    w_lat = jax.random.uniform(k1, (latent_size, hidden_size),
                               minval=-k_lin, maxval=k_lin, dtype=jnp.float32)
    b_lat = jax.random.uniform(k2, (latent_size,),
                               minval=-k_lin, maxval=k_lin, dtype=jnp.float32)
    params["latent"] = (w_lat, b_lat)
    return params


# ---------------------------- pure-JAX reference ---------------------------- #
def encoder_reference(x, params, *, hidden_size, num_layers):
    """PyTorch-order (i,f,g,o) reference; validates the reordered kernel."""
    B, T, _ = x.shape
    seq = x.astype(jnp.float32)
    H = hidden_size
    for l in range(num_layers):
        w_ih, w_hh, b_ih, b_hh = params["lstm"][l]
        wiT, whT, b = w_ih.T, w_hh.T, (b_ih + b_hh)[None, :]

        def cell(carry, x_t):
            h, c = carry
            gates = x_t @ wiT + h @ whT + b
            i_g = jax.nn.sigmoid(gates[:, 0 * H:1 * H])
            f_g = jax.nn.sigmoid(gates[:, 1 * H:2 * H])
            g_g = jnp.tanh(gates[:, 2 * H:3 * H])
            o_g = jax.nn.sigmoid(gates[:, 3 * H:4 * H])
            c_new = f_g * c + i_g * g_g
            h_new = o_g * jnp.tanh(c_new)
            return (h_new, c_new), h_new

        h0 = jnp.zeros((B, H), jnp.float32)
        c0 = jnp.zeros((B, H), jnp.float32)
        (_, _), outs = jax.lax.scan(cell, (h0, c0), jnp.transpose(seq, (1, 0, 2)))
        seq = jnp.transpose(outs, (1, 0, 2))
    h_last = seq[:, -1, :]
    w_lat, b_lat = params["latent"]
    return h_last @ w_lat.T + b_lat[None, :]


# ---------------------------------- main ----------------------------------- #
if __name__ == "__main__":
    input_size = 8
    hidden_size = 32
    latent_size = 16
    num_lstm_layers = 2
    batch = 2
    seq_len = 8

    key = jax.random.PRNGKey(0)
    key, kx = jax.random.split(key)
    x = jax.random.normal(kx, (batch, seq_len, input_size), dtype=jnp.float32)
    params = init_params(key, input_size, hidden_size, latent_size, num_lstm_layers)

    out = encoder_forward(x, params, hidden_size=hidden_size,
                          latent_size=latent_size, num_layers=num_lstm_layers)
    out = jax.block_until_ready(out)

    ref = encoder_reference(x, params, hidden_size=hidden_size,
                            num_layers=num_lstm_layers)
    ref = jax.block_until_ready(ref)

    assert out.shape == (batch, latent_size)
    np.testing.assert_allclose(np.asarray(out), np.asarray(ref), rtol=1e-4, atol=1e-4)
    print("KERNEL_OK")
</pallas_src>

<mosaic_0001>
module attributes {stable_mosaic.version = 11 : i64} {
  func.func @kernel(%arg0: memref<64x8xf32, #tpu.memory_space<vmem>>, %arg1: memref<8x128xf32, #tpu.memory_space<vmem>>, %arg2: memref<32x128xf32, #tpu.memory_space<vmem>>, %arg3: memref<1x128xf32, #tpu.memory_space<vmem>>, %arg4: memref<32x128xf32, #tpu.memory_space<vmem>>, %arg5: memref<32x128xf32, #tpu.memory_space<vmem>>, %arg6: memref<1x128xf32, #tpu.memory_space<vmem>>, %arg7: memref<32x128xf32, #tpu.memory_space<vmem>>, %arg8: memref<1x128xf32, #tpu.memory_space<vmem>>, %arg9: memref<8x128xf32, #tpu.memory_space<vmem>>, %arg10: memref<64x128xf32, #tpu.memory_space<vmem>>, %arg11: memref<64x32xf32, #tpu.memory_space<vmem>>) attributes {dimension_semantics = [], scalar_prefetch = 0 : i64, scratch_operands = 2 : i64, tpu.core_type = #tpu.core_type<tc>} {
    %c0 = arith.constant 0 : index
    %c0_0 = arith.constant 0 : index
    %0 = vector.load %arg1[%c0, %c0_0] : memref<8x128xf32, #tpu.memory_space<vmem>>, vector<8x128xf32>
    %c0_1 = arith.constant 0 : index
    %c0_2 = arith.constant 0 : index
    %1 = vector.load %arg2[%c0_1, %c0_2] : memref<32x128xf32, #tpu.memory_space<vmem>>, vector<32x128xf32>
    %c0_3 = arith.constant 0 : index
    %c0_4 = arith.constant 0 : index
    %2 = vector.load %arg3[%c0_3, %c0_4] : memref<1x128xf32, #tpu.memory_space<vmem>>, vector<1x128xf32>
    %c0_5 = arith.constant 0 : index
    %c0_6 = arith.constant 0 : index
    %3 = vector.load %arg0[%c0_5, %c0_6] : memref<64x8xf32, #tpu.memory_space<vmem>>, vector<64x8xf32>
    %cst = arith.constant dense<0.000000e+00> : vector<64x128xf32>
    %4 = tpu.matmul %3, %0, %cst {dimension_numbers = #tpu.dot_dimension_numbers<[1], [0], [0], [1], [0, 0, 1, 1], [], []>} : vector<64x8xf32>, vector<8x128xf32>, vector<64x128xf32> -> vector<64x128xf32>
    %5 = vector.broadcast %2 : vector<1x128xf32> to vector<64x128xf32>
    %6 = arith.addf %4, %5 : vector<64x128xf32>
    %c0_7 = arith.constant 0 : index
    %c0_8 = arith.constant 0 : index
    %7 = vector.load %arg10[%c0_7, %c0_8] : memref<64x128xf32, #tpu.memory_space<vmem>>, vector<64x128xf32>
    tpu.vector_store %arg10[%c0_7, %c0_8], %6 {strides = array<i32>} : memref<64x128xf32, #tpu.memory_space<vmem>>, vector<64x128xf32>,
    %cst_9 = arith.constant 0.000000e+00 : f32
    %8 = vector.broadcast %cst_9 : f32 to vector<8x32xf32>
    %cst_10 = arith.constant 0.000000e+00 : f32
    %9 = vector.broadcast %cst_10 : f32 to vector<8x32xf32>
    %c0_i32 = arith.constant 0 : i32
    %c8_i32 = arith.constant 8 : i32
    %10 = arith.muli %c0_i32, %c8_i32 : i32
    %11 = tpu.assume_multiple %10, 8 : i32
    %12 = arith.index_cast %11 : i32 to index
    %c0_11 = arith.constant 0 : index
    %13 = vector.load %arg10[%12, %c0_11] : memref<64x128xf32, #tpu.memory_space<vmem>>, vector<8x128xf32>
    %cst_12 = arith.constant dense<0.000000e+00> : vector<8x128xf32>
    %14 = tpu.matmul %8, %1, %cst_12 {dimension_numbers = #tpu.dot_dimension_numbers<[1], [0], [0], [1], [0, 0, 1, 1], [], []>} : vector<8x32xf32>, vector<32x128xf32>, vector<8x128xf32> -> vector<8x128xf32>
    %15 = arith.addf %13, %14 : vector<8x128xf32>
    %16 = vector.extract_strided_slice %15 {offsets = [0, 0], sizes = [8, 96], strides = [1, 1]} : vector<8x128xf32> to vector<8x96xf32>
    %17 = arith.negf %16 : vector<8x96xf32>
    %18 = math.exp %17 : vector<8x96xf32>
    %cst_13 = arith.constant 1.000000e+00 : f32
    %19 = vector.broadcast %cst_13 : f32 to vector<8x96xf32>
    %20 = arith.addf %19, %18 : vector<8x96xf32>
    %21 = arith.divf %19, %20 : vector<8x96xf32>
    %22 = vector.extract_strided_slice %15 {offsets = [0, 96], sizes = [8, 32], strides = [1, 1]} : vector<8x128xf32> to vector<8x32xf32>
    %23 = math.tanh %22 : vector<8x32xf32>
    %24 = vector.extract_strided_slice %21 {offsets = [0, 0], sizes = [8, 32], strides = [1, 1]} : vector<8x96xf32> to vector<8x32xf32>
    %25 = vector.extract_strided_slice %21 {offsets = [0, 32], sizes = [8, 32], strides = [1, 1]} : vector<8x96xf32> to vector<8x32xf32>
    %26 = vector.extract_strided_slice %21 {offsets = [0, 64], sizes = [8, 32], strides = [1, 1]} : vector<8x96xf32> to vector<8x32xf32>
    %27 = arith.mulf %25, %9 : vector<8x32xf32>
    %28 = arith.mulf %24, %23 : vector<8x32xf32>
    %29 = arith.addf %27, %28 : vector<8x32xf32>
    %30 = math.tanh %29 : vector<8x32xf32>
    %31 = arith.mulf %26, %30 : vector<8x32xf32>
    %32 = arith.index_cast %11 : i32 to index
    %c0_14 = arith.constant 0 : index
    %33 = vector.load %arg11[%32, %c0_14] : memref<64x32xf32, #tpu.memory_space<vmem>>, vector<8x32xf32>
    tpu.vector_store %arg11[%32, %c0_14], %31 {strides = array<i32>} : memref<64x32xf32, #tpu.memory_space<vmem>>, vector<8x32xf32>,
    %c1_i32 = arith.constant 1 : i32
    %c8_i32_15 = arith.constant 8 : i32
    %34 = arith.muli %c1_i32, %c8_i32_15 : i32
    %35 = tpu.assume_multiple %34, 8 : i32
    %36 = arith.index_cast %35 : i32 to index
    %c0_16 = arith.constant 0 : index
    %37 = vector.load %arg10[%36, %c0_16] : memref<64x128xf32, #tpu.memory_space<vmem>>, vector<8x128xf32>
    %cst_17 = arith.constant dense<0.000000e+00> : vector<8x128xf32>
    %38 = tpu.matmul %31, %1, %cst_17 {dimension_numbers = #tpu.dot_dimension_numbers<[1], [0], [0], [1], [0, 0, 1, 1], [], []>} : vector<8x32xf32>, vector<32x128xf32>, vector<8x128xf32> -> vector<8x128xf32>
    %39 = arith.addf %37, %38 : vector<8x128xf32>
    %40 = vector.extract_strided_slice %39 {offsets = [0, 0], sizes = [8, 96], strides = [1, 1]} : vector<8x128xf32> to vector<8x96xf32>
    %41 = arith.negf %40 : vector<8x96xf32>
    %42 = math.exp %41 : vector<8x96xf32>
    %cst_18 = arith.constant 1.000000e+00 : f32
    %43 = vector.broadcast %cst_18 : f32 to vector<8x96xf32>
    %44 = arith.addf %43, %42 : vector<8x96xf32>
    %45 = arith.divf %43, %44 : vector<8x96xf32>
    %46 = vector.extract_strided_slice %39 {offsets = [0, 96], sizes = [8, 32], strides = [1, 1]} : vector<8x128xf32> to vector<8x32xf32>
    %47 = math.tanh %46 : vector<8x32xf32>
    %48 = vector.extract_strided_slice %45 {offsets = [0, 0], sizes = [8, 32], strides = [1, 1]} : vector<8x96xf32> to vector<8x32xf32>
    %49 = vector.extract_strided_slice %45 {offsets = [0, 32], sizes = [8, 32], strides = [1, 1]} : vector<8x96xf32> to vector<8x32xf32>
    %50 = vector.extract_strided_slice %45 {offsets = [0, 64], sizes = [8, 32], strides = [1, 1]} : vector<8x96xf32> to vector<8x32xf32>
    %51 = arith.mulf %49, %29 : vector<8x32xf32>
    %52 = arith.mulf %48, %47 : vector<8x32xf32>
    %53 = arith.addf %51, %52 : vector<8x32xf32>
    %54 = math.tanh %53 : vector<8x32xf32>
    %55 = arith.mulf %50, %54 : vector<8x32xf32>
    %56 = arith.index_cast %35 : i32 to index
    %c0_19 = arith.constant 0 : index
    %57 = vector.load %arg11[%56, %c0_19] : memref<64x32xf32, #tpu.memory_space<vmem>>, vector<8x32xf32>
    tpu.vector_store %arg11[%56, %c0_19], %55 {strides = array<i32>} : memref<64x32xf32, #tpu.memory_space<vmem>>, vector<8x32xf32>,
    %c2_i32 = arith.constant 2 : i32
    %c8_i32_20 = arith.constant 8 : i32
    %58 = arith.muli %c2_i32, %c8_i32_20 : i32
    %59 = tpu.assume_multiple %58, 8 : i32
    %60 = arith.index_cast %59 : i32 to index
    %c0_21 = arith.constant 0 : index
    %61 = vector.load %arg10[%60, %c0_21] : memref<64x128xf32, #tpu.memory_space<vmem>>, vector<8x128xf32>
    %cst_22 = arith.constant dense<0.000000e+00> : vector<8x128xf32>
    %62 = tpu.matmul %55, %1, %cst_22 {dimension_numbers = #tpu.dot_dimension_numbers<[1], [0], [0], [1], [0, 0, 1, 1], [], []>} : vector<8x32xf32>, vector<32x128xf32>, vector<8x128xf32> -> vector<8x128xf32>
    %63 = arith.addf %61, %62 : vector<8x128xf32>
    %64 = vector.extract_strided_slice %63 {offsets = [0, 0], sizes = [8, 96], strides = [1, 1]} : vector<8x128xf32> to vector<8x96xf32>
    %65 = arith.negf %64 : vector<8x96xf32>
    %66 = math.exp %65 : vector<8x96xf32>
    %cst_23 = arith.constant 1.000000e+00 : f32
    %67 = vector.broadcast %cst_23 : f32 to vector<8x96xf32>
    %68 = arith.addf %67, %66 : vector<8x96xf32>
    %69 = arith.divf %67, %68 : vector<8x96xf32>
    %70 = vector.extract_strided_slice %63 {offsets = [0, 96], sizes = [8, 32], strides = [1, 1]} : vector<8x128xf32> to vector<8x32xf32>
    %71 = math.tanh %70 : vector<8x32xf32>
    %72 = vector.extract_strided_slice %69 {offsets = [0, 0], sizes = [8, 32], strides = [1, 1]} : vector<8x96xf32> to vector<8x32xf32>
    %73 = vector.extract_strided_slice %69 {offsets = [0, 32], sizes = [8, 32], strides = [1, 1]} : vector<8x96xf32> to vector<8x32xf32>
    %74 = vector.extract_strided_slice %69 {offsets = [0, 64], sizes = [8, 32], strides = [1, 1]} : vector<8x96xf32> to vector<8x32xf32>
    %75 = arith.mulf %73, %53 : vector<8x32xf32>
    %76 = arith.mulf %72, %71 : vector<8x32xf32>
    %77 = arith.addf %75, %76 : vector<8x32xf32>
    %78 = math.tanh %77 : vector<8x32xf32>
    %79 = arith.mulf %74, %78 : vector<8x32xf32>
    %80 = arith.index_cast %59 : i32 to index
    %c0_24 = arith.constant 0 : index
    %81 = vector.load %arg11[%80, %c0_24] : memref<64x32xf32, #tpu.memory_space<vmem>>, vector<8x32xf32>
    tpu.vector_store %arg11[%80, %c0_24], %79 {strides = array<i32>} : memref<64x32xf32, #tpu.memory_space<vmem>>, vector<8x32xf32>,
    %c3_i32 = arith.constant 3 : i32
    %c8_i32_25 = arith.constant 8 : i32
    %82 = arith.muli %c3_i32, %c8_i32_25 : i32
    %83 = tpu.assume_multiple %82, 8 : i32
    %84 = arith.index_cast %83 : i32 to index
    %c0_26 = arith.constant 0 : index
    %85 = vector.load %arg10[%84, %c0_26] : memref<64x128xf32, #tpu.memory_space<vmem>>, vector<8x128xf32>
    %cst_27 = arith.constant dense<0.000000e+00> : vector<8x128xf32>
    %86 = tpu.matmul %79, %1, %cst_27 {dimension_numbers = #tpu.dot_dimension_numbers<[1], [0], [0], [1], [0, 0, 1, 1], [], []>} : vector<8x32xf32>, vector<32x128xf32>, vector<8x128xf32> -> vector<8x128xf32>
    %87 = arith.addf %85, %86 : vector<8x128xf32>
    %88 = vector.extract_strided_slice %87 {offsets = [0, 0], sizes = [8, 96], strides = [1, 1]} : vector<8x128xf32> to vector<8x96xf32>
    %89 = arith.negf %88 : vector<8x96xf32>
    %90 = math.exp %89 : vector<8x96xf32>
    %cst_28 = arith.constant 1.000000e+00 : f32
    %91 = vector.broadcast %cst_28 : f32 to vector<8x96xf32>
    %92 = arith.addf %91, %90 : vector<8x96xf32>
    %93 = arith.divf %91, %92 : vector<8x96xf32>
    %94 = vector.extract_strided_slice %87 {offsets = [0, 96], sizes = [8, 32], strides = [1, 1]} : vector<8x128xf32> to vector<8x32xf32>
    %95 = math.tanh %94 : vector<8x32xf32>
    %96 = vector.extract_strided_slice %93 {offsets = [0, 0], sizes = [8, 32], strides = [1, 1]} : vector<8x96xf32> to vector<8x32xf32>
    %97 = vector.extract_strided_slice %93 {offsets = [0, 32], sizes = [8, 32], strides = [1, 1]} : vector<8x96xf32> to vector<8x32xf32>
    %98 = vector.extract_strided_slice %93 {offsets = [0, 64], sizes = [8, 32], strides = [1, 1]} : vector<8x96xf32> to vector<8x32xf32>
    %99 = arith.mulf %97, %77 : vector<8x32xf32>
    %100 = arith.mulf %96, %95 : vector<8x32xf32>
    %101 = arith.addf %99, %100 : vector<8x32xf32>
    %102 = math.tanh %101 : vector<8x32xf32>
    %103 = arith.mulf %98, %102 : vector<8x32xf32>
    %104 = arith.index_cast %83 : i32 to index
    %c0_29 = arith.constant 0 : index
    %105 = vector.load %arg11[%104, %c0_29] : memref<64x32xf32, #tpu.memory_space<vmem>>, vector<8x32xf32>
    tpu.vector_store %arg11[%104, %c0_29], %103 {strides = array<i32>} : memref<64x32xf32, #tpu.memory_space<vmem>>, vector<8x32xf32>,
    %c4_i32 = arith.constant 4 : i32
    %c8_i32_30 = arith.constant 8 : i32
    %106 = arith.muli %c4_i32, %c8_i32_30 : i32
    %107 = tpu.assume_multiple %106, 8 : i32
    %108 = arith.index_cast %107 : i32 to index
    %c0_31 = arith.constant 0 : index
    %109 = vector.load %arg10[%108, %c0_31] : memref<64x128xf32, #tpu.memory_space<vmem>>, vector<8x128xf32>
    %cst_32 = arith.constant dense<0.000000e+00> : vector<8x128xf32>
    %110 = tpu.matmul %103, %1, %cst_32 {dimension_numbers = #tpu.dot_dimension_numbers<[1], [0], [0], [1], [0, 0, 1, 1], [], []>} : vector<8x32xf32>, vector<32x128xf32>, vector<8x128xf32> -> vector<8x128xf32>
    %111 = arith.addf %109, %110 : vector<8x128xf32>
    %112 = vector.extract_strided_slice %111 {offsets = [0, 0], sizes = [8, 96], strides = [1, 1]} : vector<8x128xf32> to vector<8x96xf32>
    %113 = arith.negf %112 : vector<8x96xf32>
    %114 = math.exp %113 : vector<8x96xf32>
    %cst_33 = arith.constant 1.000000e+00 : f32
    %115 = vector.broadcast %cst_33 : f32 to vector<8x96xf32>
    %116 = arith.addf %115, %114 : vector<8x96xf32>
    %117 = arith.divf %115, %116 : vector<8x96xf32>
    %118 = vector.extract_strided_slice %111 {offsets = [0, 96], sizes = [8, 32], strides = [1, 1]} : vector<8x128xf32> to vector<8x32xf32>
    %119 = math.tanh %118 : vector<8x32xf32>
    %120 = vector.extract_strided_slice %117 {offsets = [0, 0], sizes = [8, 32], strides = [1, 1]} : vector<8x96xf32> to vector<8x32xf32>
    %121 = vector.extract_strided_slice %117 {offsets = [0, 32], sizes = [8, 32], strides = [1, 1]} : vector<8x96xf32> to vector<8x32xf32>
    %122 = vector.extract_strided_slice %117 {offsets = [0, 64], sizes = [8, 32], strides = [1, 1]} : vector<8x96xf32> to vector<8x32xf32>
    %123 = arith.mulf %121, %101 : vector<8x32xf32>
    %124 = arith.mulf %120, %119 : vector<8x32xf32>
    %125 = arith.addf %123, %124 : vector<8x32xf32>
    %126 = math.tanh %125 : vector<8x32xf32>
    %127 = arith.mulf %122, %126 : vector<8x32xf32>
    %128 = arith.index_cast %107 : i32 to index
    %c0_34 = arith.constant 0 : index
    %129 = vector.load %arg11[%128, %c0_34] : memref<64x32xf32, #tpu.memory_space<vmem>>, vector<8x32xf32>
    tpu.vector_store %arg11[%128, %c0_34], %127 {strides = array<i32>} : memref<64x32xf32, #tpu.memory_space<vmem>>, vector<8x32xf32>,
    %c5_i32 = arith.constant 5 : i32
    %c8_i32_35 = arith.constant 8 : i32
    %130 = arith.muli %c5_i32, %c8_i32_35 : i32
    %131 = tpu.assume_multiple %130, 8 : i32
    %132 = arith.index_cast %131 : i32 to index
    %c0_36 = arith.constant 0 : index
    %133 = vector.load %arg10[%132, %c0_36] : memref<64x128xf32, #tpu.memory_space<vmem>>, vector<8x128xf32>
    %cst_37 = arith.constant dense<0.000000e+00> : vector<8x128xf32>
    %134 = tpu.matmul %127, %1, %cst_37 {dimension_numbers = #tpu.dot_dimension_numbers<[1], [0], [0], [1], [0, 0, 1, 1], [], []>} : vector<8x32xf32>, vector<32x128xf32>, vector<8x128xf32> -> vector<8x128xf32>
    %135 = arith.addf %133, %134 : vector<8x128xf32>
    %136 = vector.extract_strided_slice %135 {offsets = [0, 0], sizes = [8, 96], strides = [1, 1]} : vector<8x128xf32> to vector<8x96xf32>
    %137 = arith.negf %136 : vector<8x96xf32>
    %138 = math.exp %137 : vector<8x96xf32>
    %cst_38 = arith.constant 1.000000e+00 : f32
    %139 = vector.broadcast %cst_38 : f32 to vector<8x96xf32>
    %140 = arith.addf %139, %138 : vector<8x96xf32>
    %141 = arith.divf %139, %140 : vector<8x96xf32>
    %142 = vector.extract_strided_slice %135 {offsets = [0, 96], sizes = [8, 32], strides = [1, 1]} : vector<8x128xf32> to vector<8x32xf32>
    %143 = math.tanh %142 : vector<8x32xf32>
    %144 = vector.extract_strided_slice %141 {offsets = [0, 0], sizes = [8, 32], strides = [1, 1]} : vector<8x96xf32> to vector<8x32xf32>
    %145 = vector.extract_strided_slice %141 {offsets = [0, 32], sizes = [8, 32], strides = [1, 1]} : vector<8x96xf32> to vector<8x32xf32>
    %146 = vector.extract_strided_slice %141 {offsets = [0, 64], sizes = [8, 32], strides = [1, 1]} : vector<8x96xf32> to vector<8x32xf32>
    %147 = arith.mulf %145, %125 : vector<8x32xf32>
    %148 = arith.mulf %144, %143 : vector<8x32xf32>
    %149 = arith.addf %147, %148 : vector<8x32xf32>
    %150 = math.tanh %149 : vector<8x32xf32>
    %151 = arith.mulf %146, %150 : vector<8x32xf32>
    %152 = arith.index_cast %131 : i32 to index
    %c0_39 = arith.constant 0 : index
    %153 = vector.load %arg11[%152, %c0_39] : memref<64x32xf32, #tpu.memory_space<vmem>>, vector<8x32xf32>
    tpu.vector_store %arg11[%152, %c0_39], %151 {strides = array<i32>} : memref<64x32xf32, #tpu.memory_space<vmem>>, vector<8x32xf32>,
    %c6_i32 = arith.constant 6 : i32
    %c8_i32_40 = arith.constant 8 : i32
    %154 = arith.muli %c6_i32, %c8_i32_40 : i32
    %155 = tpu.assume_multiple %154, 8 : i32
    %156 = arith.index_cast %155 : i32 to index
    %c0_41 = arith.constant 0 : index
    %157 = vector.load %arg10[%156, %c0_41] : memref<64x128xf32, #tpu.memory_space<vmem>>, vector<8x128xf32>
    %cst_42 = arith.constant dense<0.000000e+00> : vector<8x128xf32>
    %158 = tpu.matmul %151, %1, %cst_42 {dimension_numbers = #tpu.dot_dimension_numbers<[1], [0], [0], [1], [0, 0, 1, 1], [], []>} : vector<8x32xf32>, vector<32x128xf32>, vector<8x128xf32> -> vector<8x128xf32>
    %159 = arith.addf %157, %158 : vector<8x128xf32>
    %160 = vector.extract_strided_slice %159 {offsets = [0, 0], sizes = [8, 96], strides = [1, 1]} : vector<8x128xf32> to vector<8x96xf32>
    %161 = arith.negf %160 : vector<8x96xf32>
    %162 = math.exp %161 : vector<8x96xf32>
    %cst_43 = arith.constant 1.000000e+00 : f32
    %163 = vector.broadcast %cst_43 : f32 to vector<8x96xf32>
    %164 = arith.addf %163, %162 : vector<8x96xf32>
    %165 = arith.divf %163, %164 : vector<8x96xf32>
    %166 = vector.extract_strided_slice %159 {offsets = [0, 96], sizes = [8, 32], strides = [1, 1]} : vector<8x128xf32> to vector<8x32xf32>
    %167 = math.tanh %166 : vector<8x32xf32>
    %168 = vector.extract_strided_slice %165 {offsets = [0, 0], sizes = [8, 32], strides = [1, 1]} : vector<8x96xf32> to vector<8x32xf32>
    %169 = vector.extract_strided_slice %165 {offsets = [0, 32], sizes = [8, 32], strides = [1, 1]} : vector<8x96xf32> to vector<8x32xf32>
    %170 = vector.extract_strided_slice %165 {offsets = [0, 64], sizes = [8, 32], strides = [1, 1]} : vector<8x96xf32> to vector<8x32xf32>
    %171 = arith.mulf %169, %149 : vector<8x32xf32>
    %172 = arith.mulf %168, %167 : vector<8x32xf32>
    %173 = arith.addf %171, %172 : vector<8x32xf32>
    %174 = math.tanh %173 : vector<8x32xf32>
    %175 = arith.mulf %170, %174 : vector<8x32xf32>
    %176 = arith.index_cast %155 : i32 to index
    %c0_44 = arith.constant 0 : index
    %177 = vector.load %arg11[%176, %c0_44] : memref<64x32xf32, #tpu.memory_space<vmem>>, vector<8x32xf32>
    tpu.vector_store %arg11[%176, %c0_44], %175 {strides = array<i32>} : memref<64x32xf32, #tpu.memory_space<vmem>>, vector<8x32xf32>,
    %c7_i32 = arith.constant 7 : i32
    %c8_i32_45 = arith.constant 8 : i32
    %178 = arith.muli %c7_i32, %c8_i32_45 : i32
    %179 = tpu.assume_multiple %178, 8 : i32
    %180 = arith.index_cast %179 : i32 to index
    %c0_46 = arith.constant 0 : index
    %181 = vector.load %arg10[%180, %c0_46] : memref<64x128xf32, #tpu.memory_space<vmem>>, vector<8x128xf32>
    %cst_47 = arith.constant dense<0.000000e+00> : vector<8x128xf32>
    %182 = tpu.matmul %175, %1, %cst_47 {dimension_numbers = #tpu.dot_dimension_numbers<[1], [0], [0], [1], [0, 0, 1, 1], [], []>} : vector<8x32xf32>, vector<32x128xf32>, vector<8x128xf32> -> vector<8x128xf32>
    %183 = arith.addf %181, %182 : vector<8x128xf32>
    %184 = vector.extract_strided_slice %183 {offsets = [0, 0], sizes = [8, 96], strides = [1, 1]} : vector<8x128xf32> to vector<8x96xf32>
    %185 = arith.negf %184 : vector<8x96xf32>
    %186 = math.exp %185 : vector<8x96xf32>
    %cst_48 = arith.constant 1.000000e+00 : f32
    %187 = vector.broadcast %cst_48 : f32 to vector<8x96xf32>
    %188 = arith.addf %187, %186 : vector<8x96xf32>
    %189 = arith.divf %187, %188 : vector<8x96xf32>
    %190 = vector.extract_strided_slice %183 {offsets = [0, 96], sizes = [8, 32], strides = [1, 1]} : vector<8x128xf32> to vector<8x32xf32>
    %191 = math.tanh %190 : vector<8x32xf32>
    %192 = vector.extract_strided_slice %189 {offsets = [0, 0], sizes = [8, 32], strides = [1, 1]} : vector<8x96xf32> to vector<8x32xf32>
    %193 = vector.extract_strided_slice %189 {offsets = [0, 32], sizes = [8, 32], strides = [1, 1]} : vector<8x96xf32> to vector<8x32xf32>
    %194 = vector.extract_strided_slice %189 {offsets = [0, 64], sizes = [8, 32], strides = [1, 1]} : vector<8x96xf32> to vector<8x32xf32>
    %195 = arith.mulf %193, %173 : vector<8x32xf32>
    %196 = arith.mulf %192, %191 : vector<8x32xf32>
    %197 = arith.addf %195, %196 : vector<8x32xf32>
    %198 = math.tanh %197 : vector<8x32xf32>
    %199 = arith.mulf %194, %198 : vector<8x32xf32>
    %200 = arith.index_cast %179 : i32 to index
    %c0_49 = arith.constant 0 : index
    %201 = vector.load %arg11[%200, %c0_49] : memref<64x32xf32, #tpu.memory_space<vmem>>, vector<8x32xf32>
    tpu.vector_store %arg11[%200, %c0_49], %199 {strides = array<i32>} : memref<64x32xf32, #tpu.memory_space<vmem>>, vector<8x32xf32>,
    %c8_i32_50 = arith.constant 8 : i32
    %c0_51 = arith.constant 0 : index
    %c0_52 = arith.constant 0 : index
    %202 = vector.load %arg4[%c0_51, %c0_52] : memref<32x128xf32, #tpu.memory_space<vmem>>, vector<32x128xf32>
    %c0_53 = arith.constant 0 : index
    %c0_54 = arith.constant 0 : index
    %203 = vector.load %arg5[%c0_53, %c0_54] : memref<32x128xf32, #tpu.memory_space<vmem>>, vector<32x128xf32>
    %c0_55 = arith.constant 0 : index
    %c0_56 = arith.constant 0 : index
    %204 = vector.load %arg6[%c0_55, %c0_56] : memref<1x128xf32, #tpu.memory_space<vmem>>, vector<1x128xf32>
    %c0_57 = arith.constant 0 : index
    %c0_58 = arith.constant 0 : index
    %205 = vector.load %arg11[%c0_57, %c0_58] : memref<64x32xf32, #tpu.memory_space<vmem>>, vector<64x32xf32>
    %cst_59 = arith.constant dense<0.000000e+00> : vector<64x128xf32>
    %206 = tpu.matmul %205, %202, %cst_59 {dimension_numbers = #tpu.dot_dimension_numbers<[1], [0], [0], [1], [0, 0, 1, 1], [], []>} : vector<64x32xf32>, vector<32x128xf32>, vector<64x128xf32> -> vector<64x128xf32>
    %207 = vector.broadcast %204 : vector<1x128xf32> to vector<64x128xf32>
    %208 = arith.addf %206, %207 : vector<64x128xf32>
    %c0_60 = arith.constant 0 : index
    %c0_61 = arith.constant 0 : index
    %209 = vector.load %arg10[%c0_60, %c0_61] : memref<64x128xf32, #tpu.memory_space<vmem>>, vector<64x128xf32>
    tpu.vector_store %arg10[%c0_60, %c0_61], %208 {strides = array<i32>} : memref<64x128xf32, #tpu.memory_space<vmem>>, vector<64x128xf32>,
    %cst_62 = arith.constant 0.000000e+00 : f32
    %210 = vector.broadcast %cst_62 : f32 to vector<8x32xf32>
    %cst_63 = arith.constant 0.000000e+00 : f32
    %211 = vector.broadcast %cst_63 : f32 to vector<8x32xf32>
    %c0_i32_64 = arith.constant 0 : i32
    %c8_i32_65 = arith.constant 8 : i32
    %212 = arith.muli %c0_i32_64, %c8_i32_65 : i32
    %213 = tpu.assume_multiple %212, 8 : i32
    %214 = arith.index_cast %213 : i32 to index
    %c0_66 = arith.constant 0 : index
    %215 = vector.load %arg10[%214, %c0_66] : memref<64x128xf32, #tpu.memory_space<vmem>>, vector<8x128xf32>
    %cst_67 = arith.constant dense<0.000000e+00> : vector<8x128xf32>
    %216 = tpu.matmul %210, %203, %cst_67 {dimension_numbers = #tpu.dot_dimension_numbers<[1], [0], [0], [1], [0, 0, 1, 1], [], []>} : vector<8x32xf32>, vector<32x128xf32>, vector<8x128xf32> -> vector<8x128xf32>
    %217 = arith.addf %215, %216 : vector<8x128xf32>
    %218 = vector.extract_strided_slice %217 {offsets = [0, 0], sizes = [8, 96], strides = [1, 1]} : vector<8x128xf32> to vector<8x96xf32>
    %219 = arith.negf %218 : vector<8x96xf32>
    %220 = math.exp %219 : vector<8x96xf32>
    %cst_68 = arith.constant 1.000000e+00 : f32
    %221 = vector.broadcast %cst_68 : f32 to vector<8x96xf32>
    %222 = arith.addf %221, %220 : vector<8x96xf32>
    %223 = arith.divf %221, %222 : vector<8x96xf32>
    %224 = vector.extract_strided_slice %217 {offsets = [0, 96], sizes = [8, 32], strides = [1, 1]} : vector<8x128xf32> to vector<8x32xf32>
    %225 = math.tanh %224 : vector<8x32xf32>
    %226 = vector.extract_strided_slice %223 {offsets = [0, 0], sizes = [8, 32], strides = [1, 1]} : vector<8x96xf32> to vector<8x32xf32>
    %227 = vector.extract_strided_slice %223 {offsets = [0, 32], sizes = [8, 32], strides = [1, 1]} : vector<8x96xf32> to vector<8x32xf32>
    %228 = vector.extract_strided_slice %223 {offsets = [0, 64], sizes = [8, 32], strides = [1, 1]} : vector<8x96xf32> to vector<8x32xf32>
    %229 = arith.mulf %227, %211 : vector<8x32xf32>
    %230 = arith.mulf %226, %225 : vector<8x32xf32>
    %231 = arith.addf %229, %230 : vector<8x32xf32>
    %232 = math.tanh %231 : vector<8x32xf32>
    %233 = arith.mulf %228, %232 : vector<8x32xf32>
    %c1_i32_69 = arith.constant 1 : i32
    %c8_i32_70 = arith.constant 8 : i32
    %234 = arith.muli %c1_i32_69, %c8_i32_70 : i32
    %235 = tpu.assume_multiple %234, 8 : i32
    %236 = arith.index_cast %235 : i32 to index
    %c0_71 = arith.constant 0 : index
    %237 = vector.load %arg10[%236, %c0_71] : memref<64x128xf32, #tpu.memory_space<vmem>>, vector<8x128xf32>
    %cst_72 = arith.constant dense<0.000000e+00> : vector<8x128xf32>
    %238 = tpu.matmul %233, %203, %cst_72 {dimension_numbers = #tpu.dot_dimension_numbers<[1], [0], [0], [1], [0, 0, 1, 1], [], []>} : vector<8x32xf32>, vector<32x128xf32>, vector<8x128xf32> -> vector<8x128xf32>
    %239 = arith.addf %237, %238 : vector<8x128xf32>
    %240 = vector.extract_strided_slice %239 {offsets = [0, 0], sizes = [8, 96], strides = [1, 1]} : vector<8x128xf32> to vector<8x96xf32>
    %241 = arith.negf %240 : vector<8x96xf32>
    %242 = math.exp %241 : vector<8x96xf32>
    %cst_73 = arith.constant 1.000000e+00 : f32
    %243 = vector.broadcast %cst_73 : f32 to vector<8x96xf32>
    %244 = arith.addf %243, %242 : vector<8x96xf32>
    %245 = arith.divf %243, %244 : vector<8x96xf32>
    %246 = vector.extract_strided_slice %239 {offsets = [0, 96], sizes = [8, 32], strides = [1, 1]} : vector<8x128xf32> to vector<8x32xf32>
    %247 = math.tanh %246 : vector<8x32xf32>
    %248 = vector.extract_strided_slice %245 {offsets = [0, 0], sizes = [8, 32], strides = [1, 1]} : vector<8x96xf32> to vector<8x32xf32>
    %249 = vector.extract_strided_slice %245 {offsets = [0, 32], sizes = [8, 32], strides = [1, 1]} : vector<8x96xf32> to vector<8x32xf32>
    %250 = vector.extract_strided_slice %245 {offsets = [0, 64], sizes = [8, 32], strides = [1, 1]} : vector<8x96xf32> to vector<8x32xf32>
    %251 = arith.mulf %249, %231 : vector<8x32xf32>
    %252 = arith.mulf %248, %247 : vector<8x32xf32>
    %253 = arith.addf %251, %252 : vector<8x32xf32>
    %254 = math.tanh %253 : vector<8x32xf32>
    %255 = arith.mulf %250, %254 : vector<8x32xf32>
    %c2_i32_74 = arith.constant 2 : i32
    %c8_i32_75 = arith.constant 8 : i32
    %256 = arith.muli %c2_i32_74, %c8_i32_75 : i32
    %257 = tpu.assume_multiple %256, 8 : i32
    %258 = arith.index_cast %257 : i32 to index
    %c0_76 = arith.constant 0 : index
    %259 = vector.load %arg10[%258, %c0_76] : memref<64x128xf32, #tpu.memory_space<vmem>>, vector<8x128xf32>
    %cst_77 = arith.constant dense<0.000000e+00> : vector<8x128xf32>
    %260 = tpu.matmul %255, %203, %cst_77 {dimension_numbers = #tpu.dot_dimension_numbers<[1], [0], [0], [1], [0, 0, 1, 1], [], []>} : vector<8x32xf32>, vector<32x128xf32>, vector<8x128xf32> -> vector<8x128xf32>
    %261 = arith.addf %259, %260 : vector<8x128xf32>
    %262 = vector.extract_strided_slice %261 {offsets = [0, 0], sizes = [8, 96], strides = [1, 1]} : vector<8x128xf32> to vector<8x96xf32>
    %263 = arith.negf %262 : vector<8x96xf32>
    %264 = math.exp %263 : vector<8x96xf32>
    %cst_78 = arith.constant 1.000000e+00 : f32
    %265 = vector.broadcast %cst_78 : f32 to vector<8x96xf32>
    %266 = arith.addf %265, %264 : vector<8x96xf32>
    %267 = arith.divf %265, %266 : vector<8x96xf32>
    %268 = vector.extract_strided_slice %261 {offsets = [0, 96], sizes = [8, 32], strides = [1, 1]} : vector<8x128xf32> to vector<8x32xf32>
    %269 = math.tanh %268 : vector<8x32xf32>
    %270 = vector.extract_strided_slice %267 {offsets = [0, 0], sizes = [8, 32], strides = [1, 1]} : vector<8x96xf32> to vector<8x32xf32>
    %271 = vector.extract_strided_slice %267 {offsets = [0, 32], sizes = [8, 32], strides = [1, 1]} : vector<8x96xf32> to vector<8x32xf32>
    %272 = vector.extract_strided_slice %267 {offsets = [0, 64], sizes = [8, 32], strides = [1, 1]} : vector<8x96xf32> to vector<8x32xf32>
    %273 = arith.mulf %271, %253 : vector<8x32xf32>
    %274 = arith.mulf %270, %269 : vector<8x32xf32>
    %275 = arith.addf %273, %274 : vector<8x32xf32>
    %276 = math.tanh %275 : vector<8x32xf32>
    %277 = arith.mulf %272, %276 : vector<8x32xf32>
    %c3_i32_79 = arith.constant 3 : i32
    %c8_i32_80 = arith.constant 8 : i32
    %278 = arith.muli %c3_i32_79, %c8_i32_80 : i32
    %279 = tpu.assume_multiple %278, 8 : i32
    %280 = arith.index_cast %279 : i32 to index
    %c0_81 = arith.constant 0 : index
    %281 = vector.load %arg10[%280, %c0_81] : memref<64x128xf32, #tpu.memory_space<vmem>>, vector<8x128xf32>
    %cst_82 = arith.constant dense<0.000000e+00> : vector<8x128xf32>
    %282 = tpu.matmul %277, %203, %cst_82 {dimension_numbers = #tpu.dot_dimension_numbers<[1], [0], [0], [1], [0, 0, 1, 1], [], []>} : vector<8x32xf32>, vector<32x128xf32>, vector<8x128xf32> -> vector<8x128xf32>
    %283 = arith.addf %281, %282 : vector<8x128xf32>
    %284 = vector.extract_strided_slice %283 {offsets = [0, 0], sizes = [8, 96], strides = [1, 1]} : vector<8x128xf32> to vector<8x96xf32>
    %285 = arith.negf %284 : vector<8x96xf32>
    %286 = math.exp %285 : vector<8x96xf32>
    %cst_83 = arith.constant 1.000000e+00 : f32
    %287 = vector.broadcast %cst_83 : f32 to vector<8x96xf32>
    %288 = arith.addf %287, %286 : vector<8x96xf32>
    %289 = arith.divf %287, %288 : vector<8x96xf32>
    %290 = vector.extract_strided_slice %283 {offsets = [0, 96], sizes = [8, 32], strides = [1, 1]} : vector<8x128xf32> to vector<8x32xf32>
    %291 = math.tanh %290 : vector<8x32xf32>
    %292 = vector.extract_strided_slice %289 {offsets = [0, 0], sizes = [8, 32], strides = [1, 1]} : vector<8x96xf32> to vector<8x32xf32>
    %293 = vector.extract_strided_slice %289 {offsets = [0, 32], sizes = [8, 32], strides = [1, 1]} : vector<8x96xf32> to vector<8x32xf32>
    %294 = vector.extract_strided_slice %289 {offsets = [0, 64], sizes = [8, 32], strides = [1, 1]} : vector<8x96xf32> to vector<8x32xf32>
    %295 = arith.mulf %293, %275 : vector<8x32xf32>
    %296 = arith.mulf %292, %291 : vector<8x32xf32>
    %297 = arith.addf %295, %296 : vector<8x32xf32>
    %298 = math.tanh %297 : vector<8x32xf32>
    %299 = arith.mulf %294, %298 : vector<8x32xf32>
    %c4_i32_84 = arith.constant 4 : i32
    %c8_i32_85 = arith.constant 8 : i32
    %300 = arith.muli %c4_i32_84, %c8_i32_85 : i32
    %301 = tpu.assume_multiple %300, 8 : i32
    %302 = arith.index_cast %301 : i32 to index
    %c0_86 = arith.constant 0 : index
    %303 = vector.load %arg10[%302, %c0_86] : memref<64x128xf32, #tpu.memory_space<vmem>>, vector<8x128xf32>
    %cst_87 = arith.constant dense<0.000000e+00> : vector<8x128xf32>
    %304 = tpu.matmul %299, %203, %cst_87 {dimension_numbers = #tpu.dot_dimension_numbers<[1], [0], [0], [1], [0, 0, 1, 1], [], []>} : vector<8x32xf32>, vector<32x128xf32>, vector<8x128xf32> -> vector<8x128xf32>
    %305 = arith.addf %303, %304 : vector<8x128xf32>
    %306 = vector.extract_strided_slice %305 {offsets = [0, 0], sizes = [8, 96], strides = [1, 1]} : vector<8x128xf32> to vector<8x96xf32>
    %307 = arith.negf %306 : vector<8x96xf32>
    %308 = math.exp %307 : vector<8x96xf32>
    %cst_88 = arith.constant 1.000000e+00 : f32
    %309 = vector.broadcast %cst_88 : f32 to vector<8x96xf32>
    %310 = arith.addf %309, %308 : vector<8x96xf32>
    %311 = arith.divf %309, %310 : vector<8x96xf32>
    %312 = vector.extract_strided_slice %305 {offsets = [0, 96], sizes = [8, 32], strides = [1, 1]} : vector<8x128xf32> to vector<8x32xf32>
    %313 = math.tanh %312 : vector<8x32xf32>
    %314 = vector.extract_strided_slice %311 {offsets = [0, 0], sizes = [8, 32], strides = [1, 1]} : vector<8x96xf32> to vector<8x32xf32>
    %315 = vector.extract_strided_slice %311 {offsets = [0, 32], sizes = [8, 32], strides = [1, 1]} : vector<8x96xf32> to vector<8x32xf32>
    %316 = vector.extract_strided_slice %311 {offsets = [0, 64], sizes = [8, 32], strides = [1, 1]} : vector<8x96xf32> to vector<8x32xf32>
    %317 = arith.mulf %315, %297 : vector<8x32xf32>
    %318 = arith.mulf %314, %313 : vector<8x32xf32>
    %319 = arith.addf %317, %318 : vector<8x32xf32>
    %320 = math.tanh %319 : vector<8x32xf32>
    %321 = arith.mulf %316, %320 : vector<8x32xf32>
    %c5_i32_89 = arith.constant 5 : i32
    %c8_i32_90 = arith.constant 8 : i32
    %322 = arith.muli %c5_i32_89, %c8_i32_90 : i32
    %323 = tpu.assume_multiple %322, 8 : i32
    %324 = arith.index_cast %323 : i32 to index
    %c0_91 = arith.constant 0 : index
    %325 = vector.load %arg10[%324, %c0_91] : memref<64x128xf32, #tpu.memory_space<vmem>>, vector<8x128xf32>
    %cst_92 = arith.constant dense<0.000000e+00> : vector<8x128xf32>
    %326 = tpu.matmul %321, %203, %cst_92 {dimension_numbers = #tpu.dot_dimension_numbers<[1], [0], [0], [1], [0, 0, 1, 1], [], []>} : vector<8x32xf32>, vector<32x128xf32>, vector<8x128xf32> -> vector<8x128xf32>
    %327 = arith.addf %325, %326 : vector<8x128xf32>
    %328 = vector.extract_strided_slice %327 {offsets = [0, 0], sizes = [8, 96], strides = [1, 1]} : vector<8x128xf32> to vector<8x96xf32>
    %329 = arith.negf %328 : vector<8x96xf32>
    %330 = math.exp %329 : vector<8x96xf32>
    %cst_93 = arith.constant 1.000000e+00 : f32
    %331 = vector.broadcast %cst_93 : f32 to vector<8x96xf32>
    %332 = arith.addf %331, %330 : vector<8x96xf32>
    %333 = arith.divf %331, %332 : vector<8x96xf32>
    %334 = vector.extract_strided_slice %327 {offsets = [0, 96], sizes = [8, 32], strides = [1, 1]} : vector<8x128xf32> to vector<8x32xf32>
    %335 = math.tanh %334 : vector<8x32xf32>
    %336 = vector.extract_strided_slice %333 {offsets = [0, 0], sizes = [8, 32], strides = [1, 1]} : vector<8x96xf32> to vector<8x32xf32>
    %337 = vector.extract_strided_slice %333 {offsets = [0, 32], sizes = [8, 32], strides = [1, 1]} : vector<8x96xf32> to vector<8x32xf32>
    %338 = vector.extract_strided_slice %333 {offsets = [0, 64], sizes = [8, 32], strides = [1, 1]} : vector<8x96xf32> to vector<8x32xf32>
    %339 = arith.mulf %337, %319 : vector<8x32xf32>
    %340 = arith.mulf %336, %335 : vector<8x32xf32>
    %341 = arith.addf %339, %340 : vector<8x32xf32>
    %342 = math.tanh %341 : vector<8x32xf32>
    %343 = arith.mulf %338, %342 : vector<8x32xf32>
    %c6_i32_94 = arith.constant 6 : i32
    %c8_i32_95 = arith.constant 8 : i32
    %344 = arith.muli %c6_i32_94, %c8_i32_95 : i32
    %345 = tpu.assume_multiple %344, 8 : i32
    %346 = arith.index_cast %345 : i32 to index
    %c0_96 = arith.constant 0 : index
    %347 = vector.load %arg10[%346, %c0_96] : memref<64x128xf32, #tpu.memory_space<vmem>>, vector<8x128xf32>
    %cst_97 = arith.constant dense<0.000000e+00> : vector<8x128xf32>
    %348 = tpu.matmul %343, %203, %cst_97 {dimension_numbers = #tpu.dot_dimension_numbers<[1], [0], [0], [1], [0, 0, 1, 1], [], []>} : vector<8x32xf32>, vector<32x128xf32>, vector<8x128xf32> -> vector<8x128xf32>
    %349 = arith.addf %347, %348 : vector<8x128xf32>
    %350 = vector.extract_strided_slice %349 {offsets = [0, 0], sizes = [8, 96], strides = [1, 1]} : vector<8x128xf32> to vector<8x96xf32>
    %351 = arith.negf %350 : vector<8x96xf32>
    %352 = math.exp %351 : vector<8x96xf32>
    %cst_98 = arith.constant 1.000000e+00 : f32
    %353 = vector.broadcast %cst_98 : f32 to vector<8x96xf32>
    %354 = arith.addf %353, %352 : vector<8x96xf32>
    %355 = arith.divf %353, %354 : vector<8x96xf32>
    %356 = vector.extract_strided_slice %349 {offsets = [0, 96], sizes = [8, 32], strides = [1, 1]} : vector<8x128xf32> to vector<8x32xf32>
    %357 = math.tanh %356 : vector<8x32xf32>
    %358 = vector.extract_strided_slice %355 {offsets = [0, 0], sizes = [8, 32], strides = [1, 1]} : vector<8x96xf32> to vector<8x32xf32>
    %359 = vector.extract_strided_slice %355 {offsets = [0, 32], sizes = [8, 32], strides = [1, 1]} : vector<8x96xf32> to vector<8x32xf32>
    %360 = vector.extract_strided_slice %355 {offsets = [0, 64], sizes = [8, 32], strides = [1, 1]} : vector<8x96xf32> to vector<8x32xf32>
    %361 = arith.mulf %359, %341 : vector<8x32xf32>
    %362 = arith.mulf %358, %357 : vector<8x32xf32>
    %363 = arith.addf %361, %362 : vector<8x32xf32>
    %364 = math.tanh %363 : vector<8x32xf32>
    %365 = arith.mulf %360, %364 : vector<8x32xf32>
    %c7_i32_99 = arith.constant 7 : i32
    %c8_i32_100 = arith.constant 8 : i32
    %366 = arith.muli %c7_i32_99, %c8_i32_100 : i32
    %367 = tpu.assume_multiple %366, 8 : i32
    %368 = arith.index_cast %367 : i32 to index
    %c0_101 = arith.constant 0 : index
    %369 = vector.load %arg10[%368, %c0_101] : memref<64x128xf32, #tpu.memory_space<vmem>>, vector<8x128xf32>
    %cst_102 = arith.constant dense<0.000000e+00> : vector<8x128xf32>
    %370 = tpu.matmul %365, %203, %cst_102 {dimension_numbers = #tpu.dot_dimension_numbers<[1], [0], [0], [1], [0, 0, 1, 1], [], []>} : vector<8x32xf32>, vector<32x128xf32>, vector<8x128xf32> -> vector<8x128xf32>
    %371 = arith.addf %369, %370 : vector<8x128xf32>
    %372 = vector.extract_strided_slice %371 {offsets = [0, 0], sizes = [8, 96], strides = [1, 1]} : vector<8x128xf32> to vector<8x96xf32>
    %373 = arith.negf %372 : vector<8x96xf32>
    %374 = math.exp %373 : vector<8x96xf32>
    %cst_103 = arith.constant 1.000000e+00 : f32
    %375 = vector.broadcast %cst_103 : f32 to vector<8x96xf32>
    %376 = arith.addf %375, %374 : vector<8x96xf32>
    %377 = arith.divf %375, %376 : vector<8x96xf32>
    %378 = vector.extract_strided_slice %371 {offsets = [0, 96], sizes = [8, 32], strides = [1, 1]} : vector<8x128xf32> to vector<8x32xf32>
    %379 = math.tanh %378 : vector<8x32xf32>
    %380 = vector.extract_strided_slice %377 {offsets = [0, 0], sizes = [8, 32], strides = [1, 1]} : vector<8x96xf32> to vector<8x32xf32>
    %381 = vector.extract_strided_slice %377 {offsets = [0, 32], sizes = [8, 32], strides = [1, 1]} : vector<8x96xf32> to vector<8x32xf32>
    %382 = vector.extract_strided_slice %377 {offsets = [0, 64], sizes = [8, 32], strides = [1, 1]} : vector<8x96xf32> to vector<8x32xf32>
    %383 = arith.mulf %381, %363 : vector<8x32xf32>
    %384 = arith.mulf %380, %379 : vector<8x32xf32>
    %385 = arith.addf %383, %384 : vector<8x32xf32>
    %386 = math.tanh %385 : vector<8x32xf32>
    %387 = arith.mulf %382, %386 : vector<8x32xf32>
    %c8_i32_104 = arith.constant 8 : i32
    %c0_105 = arith.constant 0 : index
    %c0_106 = arith.constant 0 : index
    %388 = vector.load %arg7[%c0_105, %c0_106] : memref<32x128xf32, #tpu.memory_space<vmem>>, vector<32x128xf32>
    %cst_107 = arith.constant dense<0.000000e+00> : vector<8x128xf32>
    %389 = tpu.matmul %387, %388, %cst_107 {dimension_numbers = #tpu.dot_dimension_numbers<[1], [0], [0], [1], [0, 0, 1, 1], [], []>} : vector<8x32xf32>, vector<32x128xf32>, vector<8x128xf32> -> vector<8x128xf32>
    %c0_108 = arith.constant 0 : index
    %c0_109 = arith.constant 0 : index
    %390 = vector.load %arg8[%c0_108, %c0_109] : memref<1x128xf32, #tpu.memory_space<vmem>>, vector<1x128xf32>
    %391 = vector.broadcast %390 : vector<1x128xf32> to vector<8x128xf32>
    %392 = arith.addf %389, %391 : vector<8x128xf32>
    %c0_110 = arith.constant 0 : index
    %c0_111 = arith.constant 0 : index
    %393 = vector.load %arg9[%c0_110, %c0_111] : memref<8x128xf32, #tpu.memory_space<vmem>>, vector<8x128xf32>
    tpu.vector_store %arg9[%c0_110, %c0_111], %392 {strides = array<i32>} : memref<8x128xf32, #tpu.memory_space<vmem>>, vector<8x128xf32>,
    return
  }
}

</mosaic_0001>

<bundles_post_ra>
// kernel: tpu_custom_call.1
= control target key start
LH: loop header
LB: loop body
LE: loop exit
PB: predicated region body
PF: predicated region fallthrough
CT: control target
= control target key end

     0   :  { %14 = vsyncpa [#allocation5], 0  ;;  %s1972_s0 = inlined_call_operand.vmem [shape: f32[64,8], index: 0, kind: input, shape index: {}]   ;;  %s1973_s1 = inlined_call_operand.vmem [shape: f32[8,128], index: 1, kind: input, shape index: {}]   ;;  %s1974_s2 = inlined_call_operand.vmem [shape: f32[32,128], index: 2, kind: input, shape index: {}]   ;;  %s1975_s3 = inlined_call_operand.vmem [shape: f32[1,128], index: 3, kind: input, shape index: {}]   ;;  %s1976_s4 = inlined_call_operand.vmem [shape: f32[32,128], index: 4, kind: input, shape index: {}]   ;;  %s1977_s5 = inlined_call_operand.hbm [shape: f32[32,128], index: 5, kind: input, shape index: {}]   ;;  %s1978_s6 = inlined_call_operand.vmem [shape: f32[1,128], index: 6, kind: input, shape index: {}]   ;;  %s1979_s7 = inlined_call_operand.hbm [shape: f32[32,128], index: 7, kind: input, shape index: {}]   ;;  %s1980_s8 = inlined_call_operand.vmem [shape: f32[1,128], index: 8, kind: input, shape index: {}]   ;;  %s1981_s9 = inlined_call_operand.hbm [shape: f32[8,128], index: 9, kind: output, shape index: {}]  }
   0x1   :  { %15 = vsyncpa [#allocation8], 0 }
   0x2   :  { %16 = vsyncpa [#allocation6], 0  ;;  %s31_s11 = sshll.u32 %s1977_s5, 4  ;;  %s1617_s12 = smov [#allocation4]   ;;  %s32_s11 = int_to_ptr.hbm [resolvable:$true] %s31_s11 }
   0x3   :  { %s33_s13 = sshll.u32 %s1617_s12, 4  ;;  %s46_s16 = sshll.u32 %s1979_s7, 4  ;;  %s34_s13 = int_to_ptr.vmem [resolvable:$true] %s33_s13  ;;  %s47_s16 = int_to_ptr.hbm [resolvable:$true] %s46_s16 }
   0x4   :  { %s1618_s17 = smov 128   ;;  %s1619_s18 = smov 8  }
   0x5   :  { %39 = dma.hbm_to_vmem [thread:$0]  %s32_s11, 512, %s34_s13, [#allocation5], %s1618_s17, %s1618_s17, %s1619_s18  }
   0x6   :  { %s1620_s19 = smov [#allocation7]  }
   0x7   :  { %s48_s20 = sshll.u32 %s1620_s19, 4  ;;  %s49_s20 = int_to_ptr.vmem [resolvable:$true] %s48_s20 }
   0x8   :  { %54 = dma.hbm_to_vmem [thread:$0]  %s47_s16, 512, %s49_s20, [#allocation8], %s1618_s17, %s1618_s17, %s1619_s18  }
   0x9   :  { %1611 = dma.done.wait [#allocation5], 512  }
   0xa   :  { %1612 = vsyncadd [#allocation5], 4294966784 }
   0xb   :  { %1613 = dma.done.wait [#allocation8], 512  }
   0xc   :  { %1614 = vsyncadd [#allocation8], 4294966784  ;;  %vm82_vm0 = vcmask 64512   ;;  %v1684_v0 = vld [vmem:[%s1974_s2 + $0x18] sm:$0xff]  ;;  %v1689_v1 = vld [vmem:[%s1974_s2 + $0x10] sm:$0xff]  ;;  %v1621_v6 = vmov 0.0  }
   0xd   :  { %v65_v2 = vld [vmem:[%s1973_s1] sm:$0xff]  ;;  %173 = vmatpush.msra.mxu1 %v1684_v0  ;;  %v1701_v4 = vld [vmem:[%s1974_s2 + $0x8] sm:$0xff]  ;;  %240 = vmatpush.msra.mxu2 %v1684_v0  ;;  %s1622_s10 = smov 32   ;;  %s1623_s11 = smov 64   ;;  %v703_v34 = vld [vmem:[%s1976_s4 + $0x18] sm:$0xff]  ;;  %vm157_vm5 = vcmask 261120  }
   0xe   :  { %122 = vmatpush.msra.mxu0 %v65_v2  ;;  %v71_v3 = vld [vmem:[%s1972_s0] sm:$0xff]  ;;  %v702_v35 = vld [vmem:[%s1976_s4 + $0x10] sm:$0xff]  ;;  %v72_v36 = vld [vmem:[%s1972_s0 + $0x8] sm:$0xff]  ;;  %756 = vmatpush.msra.mxu3 %v703_v34  ;;  %s1341_s16 = sshll.u32 %s1981_s9, 4  ;;  %s1342_s16 = int_to_ptr.hbm [resolvable:$true] %s1341_s16 }
   0xf   :  { %1352 = vmatmul.msk.f32.vlgmr.msra.gmra.mxu0 %vm82_vm0, %v71_v3  ;;  %174 = vmatpush.msra.mxu1 %v1689_v1  ;;  %v1710_v5 = vld [vmem:[%s1974_s2] sm:$0xff]  ;;  %v701_v37 = vld [vmem:[%s1976_s4 + $0x8] sm:$0xff] }
  0x10   :  { %512 = vmatpush.msrb.mxu0 %v1684_v0  ;;  %241 = vmatpush.msra.mxu2 %v1689_v1  ;;  %v1736_v7 = vld [vmem:[%s1975_s3] ss:$0 sm:$0xff] }
  0x11   :  { %175 = vmatpush.msra.mxu1 %v1701_v4  ;;  %757 = vmatpush.msra.mxu3 %v702_v35  ;;  %v700_v38 = vld [vmem:[%s1976_s4] sm:$0xff] }
  0x12   :  { %513 = vmatpush.msrb.mxu0 %v1689_v1  ;;  %242 = vmatpush.msra.mxu2 %v1701_v4 }
  0x13   :  { %176 = vmatpush.msra.mxu1 %v1710_v5  ;;  %758 = vmatpush.msra.mxu3 %v701_v37 }
  0x14   :  { %514 = vmatpush.msrb.mxu0 %v1701_v4  ;;  %177 = vmatmul.f32.vlgmr.msra.gmra.mxu1 %v1621_v6 }
  0x15   :  { %243 = vmatpush.msra.mxu2 %v1710_v5  ;;  %376 = vmatpush.msrb.mxu1 %v1684_v0 }
  0x16   :  { %515 = vmatpush.msrb.mxu0 %v1710_v5  ;;  %759 = vmatpush.msra.mxu3 %v700_v38 }
  0x17   :  { %308 = vmatpush.msrb.mxu2 %v1684_v0  ;;  %377 = vmatpush.msrb.mxu1 %v1689_v1 }
  0x18   :  { %1353 = vmatmul.msk.f32.gmra.mxu0 %vm82_vm0, %v72_v36 }
  0x19   :  { %309 = vmatpush.msrb.mxu2 %v1689_v1  ;;  %378 = vmatpush.msrb.mxu1 %v1701_v4 }
  0x1b   :  { %310 = vmatpush.msrb.mxu2 %v1701_v4  ;;  %379 = vmatpush.msrb.mxu1 %v1710_v5 }
  0x1d   :  { %311 = vmatpush.msrb.mxu2 %v1710_v5  ;;  %580 = vmatpush.msra.mxu1 %v1684_v0 }
  0x1f   :  { %581 = vmatpush.msra.mxu1 %v1689_v1 }
  0x21   :  { %582 = vmatpush.msra.mxu1 %v1701_v4 }
  0x23   :  { %583 = vmatpush.msra.mxu1 %v1710_v5 }
  0x8c   :  { %v124_v8 = vpop.f32.mrf.mxu0 }
  0x8d   :  { %v125_v9 = vadd.f32 %v1736_v7, %v124_v8 }
  0x91   :  { %v178_v10 = vpop.f32.mrf.mxu1 }
  0x92   :  { %v181_v11 = vadd.f32 %v178_v10, %v125_v9  ;;  %v73_v9 = vld [vmem:[%s1972_s0 + $0x10] sm:$0xff] }
  0x93   :  { %1354 = vmatmul.msk.f32.gmra.mxu0 %vm82_vm0, %v73_v9 }
  0x94   :  { %1410 = vtanh.f32 %v181_v11  ;;  %v1360_v13 = vmul.f32 -1.442695, %v181_v11 }
  0x95   :  { %v127_v41 = vpop.f32.mrf.mxu0 }
  0x96   :  { %1412 = vpow2.f32 %v1360_v13  ;;  %v128_v42 = vadd.f32 %v1736_v7, %v127_v41 }
  0x9a   :  { %v1411_v12 = vpop.eup %1410 }
  0x9b   :  { %204 = vrot.lane.b32.xlu0 %v1411_v12, %s1622_s10 }
  0x9c   :  { %v1413_v14 = vpop.eup %1412 }
  0x9d   :  { %v185_v15 = vadd.f32 1.0, %v1413_v14 }
  0x9f   :  { %1414 = vrcp.f32 %v185_v15  ;;  %v197_v21 = vand.u32 2147483648, %v185_v15  ;;  %vm191_vm2 = vweird.f32 %v185_v15  ;;  %v195_v22 = vand.u32 2147483647, %v185_v15 }
  0xa1   :  { %v198_v24 = vor.u32 1.1754944e-38, %v197_v21  ;;  %vm196_vm4 = vcmp.eq.f32.partialorder %v195_v22, 8.507059e+37 }
  0xa5   :  { %v1415_v16 = vpop.eup %1414 }
  0xa6   :  { %v187_v17 = vmul.f32 %v1415_v16, %v185_v15  ;;  %vm192_vm1 = vweird.f32 %v1415_v16 }
  0xa7   :  { %vm193_vm3 = vmor %vm191_vm2, %vm192_vm1 }
  0xa8   :  { %v188_v18 = vsub.f32 1.0, %v187_v17 }
  0xaa   :  { %v189_v19 = vmul.f32 %v1415_v16, %v188_v18 }
  0xac   :  { %v190_v20 = vadd.f32 %v1415_v16, %v189_v19 }
  0xae   :  { %v194_v23 = vsel %vm193_vm3, %v1415_v16, %v190_v20 }
  0xaf   :  { %v199_v26 = vsel %vm196_vm4, %v198_v24, %v194_v23 }
  0xb0   :  { %v202_v28 = vmul.f32 0.0, %v199_v26 }
 0x10d   :  { %v205_v25 = vpop.permute.xlu0 %204 }
 0x10e   :  { %v207_v27 = vmul.f32 %v205_v25, %v199_v26 }
 0x110   :  { %209 = vrot.lane.b32.xlu0 %v207_v27, %s1622_s10  ;;  %v130_v12 = vpop.f32.mrf.mxu0 }
 0x111   :  { %v131_v13 = vadd.f32 %v1736_v7, %v130_v12 }
 0x182   :  { %v210_v29 = vpop.permute.xlu0 %209 }
 0x183   :  { %v212_v30 = vadd.f32 %v210_v29, %v202_v28 }
 0x185   :  { %1416 = vtanh.f32 %v212_v30 }
 0x18b   :  { %v1417_v31 = vpop.eup %1416 }
 0x18c   :  { %215 = vrot.lane.b32.xlu1 %v1417_v31, %s1622_s10 }
 0x1fe   :  { %v216_v32 = vpop.permute.xlu1 %215 }
 0x1ff   :  { %v218_v33 = vmul.f32 %v216_v32, %v199_v26  ;;  %v74_v32 = vld [vmem:[%s1972_s0 + $0x18] sm:$0xff] }
 0x200   :  { %1355 = vmatmul.msk.f32.gmra.mxu0 %vm82_vm0, %v74_v32 }
 0x201   :  { %220 = vrot.lane.b32.xlu1 %v218_v33, %s1623_s11 }
 0x273   :  { %v221_v39 = vpop.permute.xlu1 %220 }
 0x274   :  { %223 = vst.msk [vmem:[#allocation3] sm:$0xff] %vm157_vm5, %v221_v39  ;;  %1361 = vmatmul.msk.f32.vlgmr.msra.gmra.mxu2 %vm157_vm5, %v221_v39 }
 0x275   :  { %444 = vmatpush.msra.mxu2 %v1684_v0 }
 0x277   :  { %445 = vmatpush.msra.mxu2 %v1689_v1 }
 0x279   :  { %446 = vmatpush.msra.mxu2 %v1701_v4 }
 0x27b   :  { %v709_v40 = vld [vmem:[#allocation3] sm:$0xff]  ;;  %447 = vmatpush.msra.mxu2 %v1710_v5 }
 0x27c   :  { %1375 = vmatmul.msk.f32.vlgmr.msra.gmra.mxu3 %vm157_vm5, %v709_v40 }
 0x27d   :  { %v133_v37 = vpop.f32.mrf.mxu0 }
 0x27e   :  { %v134_v38 = vadd.f32 %v1736_v7, %v133_v37 }
 0x2f7   :  { %v245_v43 = vpop.f32.mrf.mxu2 }
 0x2f8   :  { %v248_v44 = vadd.f32 %v245_v43, %v128_v42 }
 0x2fa   :  { %1418 = vtanh.f32 %v248_v44  ;;  %v1362_v46 = vmul.f32 -1.442695, %v248_v44 }
 0x2fc   :  { %1420 = vpow2.f32 %v1362_v46 }
 0x300   :  { %v1419_v45 = vpop.eup %1418 }
 0x301   :  { %271 = vrot.lane.b32.xlu2 %v1419_v45, %s1622_s10 }
 0x302   :  { %v1421_v47 = vpop.eup %1420 }
 0x303   :  { %v252_v48 = vadd.f32 1.0, %v1421_v47 }
 0x305   :  { %1422 = vrcp.f32 %v252_v48  ;;  %v264_v54 = vand.u32 2147483648, %v252_v48  ;;  %vm258_vm7 = vweird.f32 %v252_v48  ;;  %v262_v55 = vand.u32 2147483647, %v252_v48 }
 0x307   :  { %v265_v57 = vor.u32 1.1754944e-38, %v264_v54  ;;  %vm263_vm9 = vcmp.eq.f32.partialorder %v262_v55, 8.507059e+37 }
 0x30b   :  { %v1423_v49 = vpop.eup %1422 }
 0x30c   :  { %v254_v50 = vmul.f32 %v1423_v49, %v252_v48  ;;  %vm259_vm6 = vweird.f32 %v1423_v49 }
 0x30d   :  { %vm260_vm8 = vmor %vm258_vm7, %vm259_vm6 }
 0x30e   :  { %v255_v51 = vsub.f32 1.0, %v254_v50 }
 0x310   :  { %v256_v52 = vmul.f32 %v1423_v49, %v255_v51 }
 0x312   :  { %v257_v53 = vadd.f32 %v1423_v49, %v256_v52 }
 0x314   :  { %v261_v56 = vsel %vm260_vm8, %v1423_v49, %v257_v53 }
 0x315   :  { %v266_v59 = vsel %vm263_vm9, %v265_v57, %v261_v56 }
 0x316   :  { %v269_v61 = vmul.f32 %v266_v59, %v212_v30 }
 0x35b   :  { %v272_v58 = vpop.permute.xlu2 %271 }
 0x35c   :  { %v274_v60 = vmul.f32 %v272_v58, %v266_v59 }
 0x35e   :  { %276 = vrot.lane.b32.xlu2 %v274_v60, %s1622_s10 }
 0x3b8   :  { %v277_v62 = vpop.permute.xlu2 %276 }
 0x3b9   :  { %v279_v63 = vadd.f32 %v277_v62, %v269_v61 }
 0x3bb   :  { %1424 = vtanh.f32 %v279_v63 }
 0x3c1   :  { %v1425_v2 = vpop.eup %1424 }
 0x3c2   :  { %282 = vrot.lane.b32.xlu0 %v1425_v2, %s1622_s10 }
 0x434   :  { %v283_v3 = vpop.permute.xlu0 %282 }
 0x435   :  { %v285_v8 = vmul.f32 %v283_v3, %v266_v59 }
 0x437   :  { %287 = vrot.lane.b32.xlu1 %v285_v8, %s1623_s11 }
 0x4a9   :  { %v288_v10 = vpop.permute.xlu1 %287 }
 0x4aa   :  { %291 = vst.msk [vmem:[#allocation3 + $0x8] sm:$0xff] %vm157_vm5, %v288_v10  ;;  %1363 = vmatmul.msk.f32.vlgmr.msrb.gmra.mxu2 %vm157_vm5, %v288_v10 }
 0x4ab   :  { %648 = vmatpush.msrb.mxu2 %v1684_v0 }
 0x4ad   :  { %649 = vmatpush.msrb.mxu2 %v1689_v1 }
 0x4af   :  { %650 = vmatpush.msrb.mxu2 %v1701_v4 }
 0x4b1   :  { %v710_v11 = vld [vmem:[#allocation3 + $0x8] sm:$0xff]  ;;  %651 = vmatpush.msrb.mxu2 %v1710_v5 }
 0x4b2   :  { %1376 = vmatmul.msk.f32.gmra.mxu3 %vm157_vm5, %v710_v11 }
 0x52d   :  { %v313_v14 = vpop.f32.mrf.mxu2 }
 0x52e   :  { %v316_v15 = vadd.f32 %v313_v14, %v131_v13 }
 0x530   :  { %1426 = vtanh.f32 %v316_v15  ;;  %v1364_v17 = vmul.f32 -1.442695, %v316_v15 }
 0x532   :  { %1428 = vpow2.f32 %v1364_v17 }
 0x536   :  { %v1427_v16 = vpop.eup %1426 }
 0x537   :  { %339 = vrot.lane.b32.xlu2 %v1427_v16, %s1622_s10 }
 0x538   :  { %v1429_v0 = vpop.eup %1428 }
 0x539   :  { %v320_v1 = vadd.f32 1.0, %v1429_v0 }
 0x53b   :  { %1430 = vrcp.f32 %v320_v1  ;;  %v332_v21 = vand.u32 2147483648, %v320_v1  ;;  %vm326_vm11 = vweird.f32 %v320_v1  ;;  %v330_v22 = vand.u32 2147483647, %v320_v1 }
 0x53d   :  { %v333_v24 = vor.u32 1.1754944e-38, %v332_v21  ;;  %vm331_vm13 = vcmp.eq.f32.partialorder %v330_v22, 8.507059e+37 }
 0x541   :  { %v1431_v4 = vpop.eup %1430 }
 0x542   :  { %v322_v18 = vmul.f32 %v1431_v4, %v320_v1  ;;  %vm327_vm10 = vweird.f32 %v1431_v4 }
 0x543   :  { %vm328_vm12 = vmor %vm326_vm11, %vm327_vm10 }
 0x544   :  { %v323_v19 = vsub.f32 1.0, %v322_v18 }
 0x546   :  { %v324_v5 = vmul.f32 %v1431_v4, %v323_v19 }
 0x548   :  { %v325_v20 = vadd.f32 %v1431_v4, %v324_v5 }
 0x54a   :  { %v329_v23 = vsel %vm328_vm12, %v1431_v4, %v325_v20 }
 0x54b   :  { %v334_v26 = vsel %vm331_vm13, %v333_v24, %v329_v23 }
 0x54c   :  { %v337_v28 = vmul.f32 %v334_v26, %v279_v63  ;;  %v75_v63 = vld [vmem:[%s1972_s0 + $0x20] sm:$0xff] }
 0x54d   :  { %1356 = vmatmul.msk.f32.gmra.mxu0 %vm82_vm0, %v75_v63  ;;  %v1838_v63 = vld [vmem:[#allocation4 + $0x18] sm:$0xff] }
 0x591   :  { %v340_v25 = vpop.permute.xlu2 %339 }
 0x592   :  { %v342_v27 = vmul.f32 %v340_v25, %v334_v26 }
 0x594   :  { %344 = vrot.lane.b32.xlu0 %v342_v27, %s1622_s10 }
 0x5ca   :  { %v136_v8 = vpop.f32.mrf.mxu0 }
 0x5cb   :  { %v137_v9 = vadd.f32 %v1736_v7, %v136_v8  ;;  %v1848_v8 = vld [vmem:[#allocation4] sm:$0xff] }
 0x606   :  { %v345_v29 = vpop.permute.xlu0 %344 }
 0x607   :  { %v347_v30 = vadd.f32 %v345_v29, %v337_v28  ;;  %v76_v28 = vld [vmem:[%s1972_s0 + $0x28] sm:$0xff]  ;;  %v77_v29 = vld [vmem:[%s1972_s0 + $0x30] sm:$0xff] }
 0x608   :  { %1357 = vmatmul.msk.f32.gmra.mxu0 %vm82_vm0, %v76_v28 }
 0x609   :  { %1432 = vtanh.f32 %v347_v30 }
 0x60f   :  { %v1433_v31 = vpop.eup %1432 }
 0x610   :  { %350 = vrot.lane.b32.xlu1 %v1433_v31, %s1622_s10  ;;  %1358 = vmatmul.msk.f32.gmra.mxu0 %vm82_vm0, %v77_v29 }
 0x682   :  { %v351_v33 = vpop.permute.xlu1 %350 }
 0x683   :  { %v353_v34 = vmul.f32 %v351_v33, %v334_v26 }
 0x685   :  { %355 = vrot.lane.b32.xlu2 %v353_v34, %s1623_s11 }
 0x6df   :  { %v356_v35 = vpop.permute.xlu2 %355 }
 0x6e0   :  { %359 = vst.msk [vmem:[#allocation3 + $0x10] sm:$0xff] %vm157_vm5, %v356_v35  ;;  %1365 = vmatmul.msk.f32.vlgmr.msrb.gmra.mxu1 %vm157_vm5, %v356_v35  ;;  %v139_v35 = vpop.f32.mrf.mxu0 }
 0x6e1   :  { %806 = vmatpush.msrb.mxu1 %v1838_v63 }
 0x6e7   :  { %v711_v36 = vld [vmem:[#allocation3 + $0x10] sm:$0xff] }
 0x6e8   :  { %1377 = vmatmul.msk.f32.gmra.mxu3 %vm157_vm5, %v711_v36  ;;  %v1826_v36 = vpop.f32.mrf.mxu0 }
 0x75d   :  { %v381_v39 = vpop.f32.mrf.mxu1 }
 0x75e   :  { %v384_v40 = vadd.f32 %v381_v39, %v134_v38  ;;  %v140_v38 = vadd.f32 %v1736_v7, %v139_v35 }
 0x760   :  { %1434 = vtanh.f32 %v384_v40  ;;  %v1366_v42 = vmul.f32 -1.442695, %v384_v40 }
 0x762   :  { %1436 = vpow2.f32 %v1366_v42 }
 0x766   :  { %v1435_v41 = vpop.eup %1434 }
 0x767   :  { %407 = vrot.lane.b32.xlu0 %v1435_v41, %s1622_s10 }
 0x768   :  { %v1437_v43 = vpop.eup %1436 }
 0x769   :  { %v388_v44 = vadd.f32 1.0, %v1437_v43 }
 0x76b   :  { %1438 = vrcp.f32 %v388_v44  ;;  %v400_v50 = vand.u32 2147483648, %v388_v44  ;;  %vm394_vm15 = vweird.f32 %v388_v44  ;;  %v398_v51 = vand.u32 2147483647, %v388_v44 }
 0x76d   :  { %v401_v53 = vor.u32 1.1754944e-38, %v400_v50  ;;  %vm399_vm2 = vcmp.eq.f32.partialorder %v398_v51, 8.507059e+37 }
 0x771   :  { %v1439_v45 = vpop.eup %1438 }
 0x772   :  { %v390_v46 = vmul.f32 %v1439_v45, %v388_v44  ;;  %vm395_vm14 = vweird.f32 %v1439_v45 }
 0x773   :  { %vm396_vm1 = vmor %vm394_vm15, %vm395_vm14 }
 0x774   :  { %v391_v47 = vsub.f32 1.0, %v390_v46 }
 0x776   :  { %v392_v48 = vmul.f32 %v1439_v45, %v391_v47 }
 0x778   :  { %v393_v49 = vadd.f32 %v1439_v45, %v392_v48 }
 0x77a   :  { %v397_v52 = vsel %vm396_vm1, %v1439_v45, %v393_v49 }
 0x77b   :  { %v402_v55 = vsel %vm399_vm2, %v401_v53, %v397_v52 }
 0x77c   :  { %v405_v57 = vmul.f32 %v402_v55, %v347_v30  ;;  %v78_v30 = vld [vmem:[%s1972_s0 + $0x38] sm:$0xff] }
 0x77d   :  { %1359 = vmatmul.msk.f32.gmra.mxu0 %vm82_vm0, %v78_v30 }
 0x7d9   :  { %v408_v54 = vpop.permute.xlu0 %407 }
 0x7da   :  { %v410_v56 = vmul.f32 %v408_v54, %v402_v55 }
 0x7dc   :  { %412 = vrot.lane.b32.xlu1 %v410_v56, %s1622_s10 }
 0x7fa   :  { %v1828_v37 = vpop.f32.mrf.mxu0 }
 0x84e   :  { %v413_v58 = vpop.permute.xlu1 %412 }
 0x84f   :  { %v415_v59 = vadd.f32 %v413_v58, %v405_v57 }
 0x851   :  { %1440 = vtanh.f32 %v415_v59 }
 0x857   :  { %v1441_v60 = vpop.eup %1440 }
 0x858   :  { %418 = vrot.lane.b32.xlu2 %v1441_v60, %s1622_s10 }
 0x8b2   :  { %v419_v61 = vpop.permute.xlu2 %418 }
 0x8b3   :  { %v421_v62 = vmul.f32 %v419_v61, %v402_v55 }
 0x8b5   :  { %423 = vrot.lane.b32.xlu0 %v421_v62, %s1623_s11 }
 0x927   :  { %v424_v2 = vpop.permute.xlu0 %423 }
 0x928   :  { %427 = vst.msk [vmem:[#allocation3 + $0x18] sm:$0xff] %vm157_vm5, %v424_v2  ;;  %1367 = vmatmul.msk.f32.vlgmr.msra.gmra.mxu2 %vm157_vm5, %v424_v2  ;;  %v1840_v2 = vld [vmem:[#allocation4 + $0x10] sm:$0xff] }
 0x929   :  { %870 = vmatpush.msra.mxu2 %v1838_v63  ;;  %807 = vmatpush.msrb.mxu1 %v1840_v2 }
 0x92b   :  { %871 = vmatpush.msra.mxu2 %v1840_v2 }
 0x92f   :  { %v712_v3 = vld [vmem:[#allocation3 + $0x18] sm:$0xff] }
 0x930   :  { %1378 = vmatmul.msk.f32.gmra.mxu3 %vm157_vm5, %v712_v3  ;;  %v1844_v3 = vld [vmem:[#allocation4 + $0x8] sm:$0xff] }
 0x931   :  { %808 = vmatpush.msrb.mxu1 %v1844_v3  ;;  %872 = vmatpush.msra.mxu2 %v1844_v3 }
 0x933   :  { %809 = vmatpush.msrb.mxu1 %v1848_v8  ;;  %873 = vmatpush.msra.mxu2 %v1848_v8 }
 0x9ab   :  { %v449_v10 = vpop.f32.mrf.mxu2 }
 0x9ac   :  { %v452_v11 = vadd.f32 %v449_v10, %v137_v9 }
 0x9ae   :  { %1442 = vtanh.f32 %v452_v11  ;;  %v1368_v13 = vmul.f32 -1.442695, %v452_v11  ;;  %v143_v11 = vadd.f32 %v1736_v7, %v1826_v36 }
 0x9b0   :  { %1444 = vpow2.f32 %v1368_v13 }
 0x9b4   :  { %v1443_v12 = vpop.eup %1442 }
 0x9b5   :  { %475 = vrot.lane.b32.xlu1 %v1443_v12, %s1622_s10 }
 0x9b6   :  { %v1445_v14 = vpop.eup %1444 }
 0x9b7   :  { %v456_v15 = vadd.f32 1.0, %v1445_v14  ;;  %v1871_v14 = vld [vmem:[%s1978_s6] ss:$0 sm:$0xff] }
 0x9b9   :  { %1446 = vrcp.f32 %v456_v15  ;;  %v468_v18 = vand.u32 2147483648, %v456_v15  ;;  %vm462_vm4 = vweird.f32 %v456_v15  ;;  %v466_v19 = vand.u32 2147483647, %v456_v15 }
 0x9bb   :  { %v469_v20 = vor.u32 1.1754944e-38, %v468_v18  ;;  %vm467_vm7 = vcmp.eq.f32.partialorder %v466_v19, 8.507059e+37 }
 0x9bf   :  { %v1447_v16 = vpop.eup %1446 }
 0x9c0   :  { %v458_v17 = vmul.f32 %v1447_v16, %v456_v15  ;;  %vm463_vm3 = vweird.f32 %v1447_v16 }
 0x9c1   :  { %vm464_vm6 = vmor %vm462_vm4, %vm463_vm3 }
 0x9c2   :  { %v459_v0 = vsub.f32 1.0, %v458_v17 }
 0x9c4   :  { %v460_v1 = vmul.f32 %v1447_v16, %v459_v0 }
 0x9c6   :  { %v461_v4 = vadd.f32 %v1447_v16, %v460_v1 }
 0x9c8   :  { %v465_v5 = vsel %vm464_vm6, %v1447_v16, %v461_v4 }
 0x9c9   :  { %v470_v22 = vsel %vm467_vm7, %v469_v20, %v465_v5 }
 0x9ca   :  { %v473_v24 = vmul.f32 %v470_v22, %v415_v59 }
 0xa27   :  { %v476_v21 = vpop.permute.xlu1 %475 }
 0xa28   :  { %v478_v23 = vmul.f32 %v476_v21, %v470_v22 }
 0xa2a   :  { %480 = vrot.lane.b32.xlu2 %v478_v23, %s1622_s10 }
 0xa84   :  { %v481_v25 = vpop.permute.xlu2 %480 }
 0xa85   :  { %v483_v26 = vadd.f32 %v481_v25, %v473_v24 }
 0xa87   :  { %1448 = vtanh.f32 %v483_v26 }
 0xa8d   :  { %v1449_v27 = vpop.eup %1448 }
 0xa8e   :  { %486 = vrot.lane.b32.xlu0 %v1449_v27, %s1622_s10 }
 0xb00   :  { %v487_v31 = vpop.permute.xlu0 %486 }
 0xb01   :  { %v489_v32 = vmul.f32 %v487_v31, %v470_v22 }
 0xb03   :  { %491 = vrot.lane.b32.xlu1 %v489_v32, %s1623_s11 }
 0xb75   :  { %v492_v33 = vpop.permute.xlu1 %491 }
 0xb76   :  { %495 = vst.msk [vmem:[#allocation3 + $0x20] sm:$0xff] %vm157_vm5, %v492_v33  ;;  %1369 = vmatmul.msk.f32.vlgmr.msrb.gmra.mxu0 %vm157_vm5, %v492_v33 }
 0xb7d   :  { %v713_v34 = vld [vmem:[#allocation3 + $0x20] sm:$0xff] }
 0xb7e   :  { %1379 = vmatmul.msk.f32.gmra.mxu3 %vm157_vm5, %v713_v34 }
 0xbf3   :  { %v517_v39 = vpop.f32.mrf.mxu0 }
 0xbf4   :  { %v520_v40 = vadd.f32 %v517_v39, %v140_v38 }
 0xbf6   :  { %1450 = vtanh.f32 %v520_v40  ;;  %v1370_v42 = vmul.f32 -1.442695, %v520_v40 }
 0xbf8   :  { %1452 = vpow2.f32 %v1370_v42 }
 0xbfc   :  { %v1451_v41 = vpop.eup %1450 }
 0xbfd   :  { %543 = vrot.lane.b32.xlu2 %v1451_v41, %s1622_s10 }
 0xbfe   :  { %v1453_v43 = vpop.eup %1452 }
 0xbff   :  { %v524_v44 = vadd.f32 1.0, %v1453_v43 }
 0xc01   :  { %1454 = vrcp.f32 %v524_v44  ;;  %v536_v50 = vand.u32 2147483648, %v524_v44  ;;  %vm530_vm8 = vweird.f32 %v524_v44  ;;  %v534_v51 = vand.u32 2147483647, %v524_v44 }
 0xc03   :  { %v537_v53 = vor.u32 1.1754944e-38, %v536_v50  ;;  %vm535_vm10 = vcmp.eq.f32.partialorder %v534_v51, 8.507059e+37 }
 0xc07   :  { %v1455_v45 = vpop.eup %1454 }
 0xc08   :  { %v526_v46 = vmul.f32 %v1455_v45, %v524_v44  ;;  %vm531_vm0 = vweird.f32 %v1455_v45 }
 0xc09   :  { %vm532_vm9 = vmor %vm530_vm8, %vm531_vm0 }
 0xc0a   :  { %v527_v47 = vsub.f32 1.0, %v526_v46 }
 0xc0c   :  { %v528_v48 = vmul.f32 %v1455_v45, %v527_v47 }
 0xc0e   :  { %v529_v49 = vadd.f32 %v1455_v45, %v528_v48 }
 0xc10   :  { %v533_v52 = vsel %vm532_vm9, %v1455_v45, %v529_v49 }
 0xc11   :  { %v538_v55 = vsel %vm535_vm10, %v537_v53, %v533_v52 }
 0xc12   :  { %v541_v57 = vmul.f32 %v538_v55, %v483_v26 }
 0xc57   :  { %v544_v54 = vpop.permute.xlu2 %543 }
 0xc58   :  { %v546_v56 = vmul.f32 %v544_v54, %v538_v55 }
 0xc5a   :  { %548 = vrot.lane.b32.xlu0 %v546_v56, %s1622_s10 }
 0xccc   :  { %v549_v58 = vpop.permute.xlu0 %548 }
 0xccd   :  { %v1833_v59 = vadd.f32 %v549_v58, %v541_v57 }
 0xccf   :  { %1456 = vtanh.f32 %v1833_v59 }
 0xcd5   :  { %v1457_v60 = vpop.eup %1456 }
 0xcd6   :  { %554 = vrot.lane.b32.xlu1 %v1457_v60, %s1622_s10 }
 0xd48   :  { %v555_v61 = vpop.permute.xlu1 %554 }
 0xd49   :  { %v557_v62 = vmul.f32 %v555_v61, %v538_v55 }
 0xd4b   :  { %559 = vrot.lane.b32.xlu2 %v557_v62, %s1623_s11 }
 0xda5   :  { %v560_v9 = vpop.permute.xlu2 %559 }
 0xda6   :  { %563 = vst.msk [vmem:[#allocation3 + $0x28] sm:$0xff] %vm157_vm5, %v560_v9  ;;  %1371 = vmatmul.msk.f32.vlgmr.msra.gmra.mxu1 %vm157_vm5, %v560_v9 }
 0xda7   :  { %934 = vmatpush.msra.mxu1 %v1838_v63 }
 0xda9   :  { %935 = vmatpush.msra.mxu1 %v1840_v2 }
 0xdab   :  { %936 = vmatpush.msra.mxu1 %v1844_v3 }
 0xdad   :  { %v714_v10 = vld [vmem:[#allocation3 + $0x28] sm:$0xff]  ;;  %937 = vmatpush.msra.mxu1 %v1848_v8 }
 0xdae   :  { %1380 = vmatmul.msk.f32.gmra.mxu3 %vm157_vm5, %v714_v10  ;;  %810 = vmatmul.f32.vlgmr.msrb.gmra.mxu1 %v1621_v6  ;;  %v761_v6 = vpop.f32.mrf.mxu3 }
 0xdaf   :  { %1062 = vmatpush.msrb.mxu1 %v1838_v63  ;;  %v762_v15 = vadd.f32 %v1871_v14, %v761_v6 }
 0xdb1   :  { %1063 = vmatpush.msrb.mxu1 %v1840_v2 }
 0xdb3   :  { %1064 = vmatpush.msrb.mxu1 %v1844_v3 }
 0xdb5   :  { %1065 = vmatpush.msrb.mxu1 %v1848_v8 }
 0xdb6   :  { %v764_v62 = vpop.f32.mrf.mxu3 }
 0xdb7   :  { %v765_v9 = vadd.f32 %v1871_v14, %v764_v62 }
 0xe23   :  { %v585_v12 = vpop.f32.mrf.mxu1 }
 0xe24   :  { %v588_v13 = vadd.f32 %v585_v12, %v143_v11 }
 0xe26   :  { %1458 = vtanh.f32 %v588_v13  ;;  %v1372_v7 = vmul.f32 -1.442695, %v588_v13 }
 0xe2b   :  { %v811_v16 = vpop.f32.mrf.mxu1 }
 0xe2c   :  { %v1459_v17 = vpop.eup %1458  ;;  %v814_v0 = vadd.f32 %v811_v16, %v762_v15 }
 0xe2d   :  { %611 = vrot.lane.b32.xlu0 %v1459_v17, %s1622_s10 }
 0xe2e   :  { %1460 = vtanh.f32 %v814_v0  ;;  %v1383_v4 = vmul.f32 -1.442695, %v814_v0 }
 0xe2f   :  { %1462 = vpow2.f32 %v1372_v7 }
 0xe30   :  { %1464 = vpow2.f32 %v1383_v4 }
 0xe34   :  { %v1461_v1 = vpop.eup %1460 }
 0xe35   :  { %837 = vrot.lane.b32.xlu1 %v1461_v1, %s1622_s10  ;;  %v1463_v18 = vpop.eup %1462 }
 0xe36   :  { %v592_v19 = vadd.f32 1.0, %v1463_v18  ;;  %v1465_v5 = vpop.eup %1464 }
 0xe37   :  { %v818_v20 = vadd.f32 1.0, %v1465_v5 }
 0xe38   :  { %1466 = vrcp.f32 %v592_v19  ;;  %v604_v29 = vand.u32 2147483648, %v592_v19  ;;  %vm598_vm12 = vweird.f32 %v592_v19  ;;  %v602_v30 = vand.u32 2147483647, %v592_v19 }
 0xe39   :  { %1468 = vrcp.f32 %v818_v20  ;;  %v830_v39 = vand.u32 2147483648, %v818_v20  ;;  %vm824_vm1 = vweird.f32 %v818_v20  ;;  %v828_v40 = vand.u32 2147483647, %v818_v20 }
 0xe3a   :  { %v605_v33 = vor.u32 1.1754944e-38, %v604_v29  ;;  %vm603_vm14 = vcmp.eq.f32.partialorder %v602_v30, 8.507059e+37  ;;  %v767_v30 = vpop.f32.mrf.mxu3 }
 0xe3b   :  { %v831_v42 = vor.u32 1.1754944e-38, %v830_v39  ;;  %vm829_vm3 = vcmp.eq.f32.partialorder %v828_v40, 8.507059e+37 }
 0xe3e   :  { %v1467_v21 = vpop.eup %1466 }
 0xe3f   :  { %v594_v22 = vmul.f32 %v1467_v21, %v592_v19  ;;  %v1469_v24 = vpop.eup %1468  ;;  %vm599_vm11 = vweird.f32 %v1467_v21 }
 0xe40   :  { %v820_v26 = vmul.f32 %v1469_v24, %v818_v20  ;;  %vm600_vm13 = vmor %vm598_vm12, %vm599_vm11  ;;  %vm825_vm15 = vweird.f32 %v1469_v24 }
 0xe41   :  { %v595_v23 = vsub.f32 1.0, %v594_v22  ;;  %vm826_vm2 = vmor %vm824_vm1, %vm825_vm15 }
 0xe42   :  { %v821_v28 = vsub.f32 1.0, %v820_v26 }
 0xe43   :  { %v596_v25 = vmul.f32 %v1467_v21, %v595_v23 }
 0xe44   :  { %v822_v32 = vmul.f32 %v1469_v24, %v821_v28 }
 0xe45   :  { %v597_v27 = vadd.f32 %v1467_v21, %v596_v25 }
 0xe46   :  { %v823_v38 = vadd.f32 %v1469_v24, %v822_v32 }
 0xe47   :  { %v601_v31 = vsel %vm600_vm13, %v1467_v21, %v597_v27 }
 0xe48   :  { %v606_v35 = vsel %vm603_vm14, %v605_v33, %v601_v31  ;;  %v827_v41 = vsel %vm826_vm2, %v1469_v24, %v823_v38  ;;  %v768_v31 = vadd.f32 %v1871_v14, %v767_v30 }
 0xe49   :  { %v832_v44 = vsel %vm829_vm3, %v831_v42, %v827_v41  ;;  %v609_v46 = vmul.f32 %v606_v35, %v1833_v59 }
 0xe4a   :  { %v835_v50 = vmul.f32 0.0, %v832_v44 }
 0xe9f   :  { %v612_v34 = vpop.permute.xlu0 %611 }
 0xea0   :  { %v614_v36 = vmul.f32 %v612_v34, %v606_v35 }
 0xea2   :  { %616 = vrot.lane.b32.xlu2 %v614_v36, %s1622_s10 }
 0xea7   :  { %v838_v43 = vpop.permute.xlu1 %837 }
 0xea8   :  { %v840_v45 = vmul.f32 %v838_v43, %v832_v44 }
 0xeaa   :  { %842 = vrot.lane.b32.xlu0 %v840_v45, %s1622_s10 }
 0xefc   :  { %v617_v47 = vpop.permute.xlu2 %616 }
 0xefd   :  { %v1879_v48 = vadd.f32 %v617_v47, %v609_v46 }
 0xeff   :  { %1470 = vtanh.f32 %v1879_v48 }
 0xf05   :  { %v1471_v49 = vpop.eup %1470 }
 0xf06   :  { %622 = vrot.lane.b32.xlu1 %v1471_v49, %s1622_s10 }
 0xf1c   :  { %v843_v51 = vpop.permute.xlu0 %842 }
 0xf1d   :  { %v845_v52 = vadd.f32 %v843_v51, %v835_v50 }
 0xf1f   :  { %1472 = vtanh.f32 %v845_v52 }
 0xf25   :  { %v1473_v53 = vpop.eup %1472 }
 0xf26   :  { %848 = vrot.lane.b32.xlu2 %v1473_v53, %s1622_s10 }
 0xf78   :  { %v623_v54 = vpop.permute.xlu1 %622 }
 0xf79   :  { %v625_v55 = vmul.f32 %v623_v54, %v606_v35 }
 0xf7b   :  { %627 = vrot.lane.b32.xlu0 %v625_v55, %s1623_s11 }
 0xf80   :  { %v849_v56 = vpop.permute.xlu2 %848 }
 0xf81   :  { %v851_v57 = vmul.f32 %v849_v56, %v832_v44 }
 0xf83   :  { %854 = vrot.lane.b32.xlu1 %v851_v57, %s1623_s11 }
 0xfed   :  { %v628_v58 = vpop.permute.xlu0 %627 }
 0xfee   :  { %631 = vst.msk [vmem:[#allocation3 + $0x30] sm:$0xff] %vm157_vm5, %v628_v58  ;;  %1373 = vmatmul.msk.f32.vlgmr.msrb.gmra.mxu2 %vm157_vm5, %v628_v58 }
 0xfef   :  { %998 = vmatpush.msrb.mxu2 %v1838_v63 }
 0xff1   :  { %999 = vmatpush.msrb.mxu2 %v1840_v2 }
 0xff3   :  { %1000 = vmatpush.msrb.mxu2 %v1844_v3 }
 0xff5   :  { %v855_v59 = vpop.permute.xlu1 %854  ;;  %v715_v60 = vld [vmem:[#allocation3 + $0x30] sm:$0xff]  ;;  %1001 = vmatpush.msrb.mxu2 %v1848_v8 }
 0xff6   :  { %1381 = vmatmul.msk.f32.gmra.mxu3 %vm157_vm5, %v715_v60  ;;  %1384 = vmatmul.msk.f32.vlgmr.msra.gmra.mxu2 %vm157_vm5, %v855_v59  ;;  %v770_v59 = vpop.f32.mrf.mxu3 }
 0xff7   :  { %1126 = vmatpush.msra.mxu2 %v1838_v63  ;;  %v771_v60 = vadd.f32 %v1871_v14, %v770_v59 }
 0xff9   :  { %1127 = vmatpush.msra.mxu2 %v1840_v2 }
 0xffb   :  { %1128 = vmatpush.msra.mxu2 %v1844_v3 }
 0xffd   :  { %1129 = vmatpush.msra.mxu2 %v1848_v8 }
0x1071   :  { %v1898_v61 = vpop.f32.mrf.mxu2 }
0x1079   :  { %v875_v10 = vpop.f32.mrf.mxu2 }
0x107a   :  { %v878_v11 = vadd.f32 %v875_v10, %v765_v9 }
0x107c   :  { %1474 = vtanh.f32 %v878_v11  ;;  %v1385_v13 = vmul.f32 -1.442695, %v878_v11 }
0x107e   :  { %1476 = vpow2.f32 %v1385_v13 }
0x1082   :  { %v1475_v12 = vpop.eup %1474 }
0x1083   :  { %901 = vrot.lane.b32.xlu2 %v1475_v12, %s1622_s10 }
0x1084   :  { %v1477_v6 = vpop.eup %1476 }
0x1085   :  { %v882_v15 = vadd.f32 1.0, %v1477_v6 }
0x1087   :  { %1478 = vrcp.f32 %v882_v15  ;;  %v894_v4 = vand.u32 2147483648, %v882_v15  ;;  %vm888_vm6 = vweird.f32 %v882_v15  ;;  %v892_v18 = vand.u32 2147483647, %v882_v15 }
0x1089   :  { %v895_v5 = vor.u32 1.1754944e-38, %v894_v4  ;;  %vm893_vm0 = vcmp.eq.f32.partialorder %v892_v18, 8.507059e+37 }
0x108d   :  { %v1479_v16 = vpop.eup %1478 }
0x108e   :  { %v884_v17 = vmul.f32 %v1479_v16, %v882_v15  ;;  %vm889_vm4 = vweird.f32 %v1479_v16 }
0x108f   :  { %vm890_vm7 = vmor %vm888_vm6, %vm889_vm4 }
0x1090   :  { %v885_v0 = vsub.f32 1.0, %v884_v17 }
0x1092   :  { %v886_v1 = vmul.f32 %v1479_v16, %v885_v0 }
0x1094   :  { %v887_v7 = vadd.f32 %v1479_v16, %v886_v1 }
0x1096   :  { %v891_v19 = vsel %vm890_vm7, %v1479_v16, %v887_v7 }
0x1097   :  { %v896_v21 = vsel %vm893_vm0, %v895_v5, %v891_v19 }
0x1098   :  { %v899_v23 = vmul.f32 %v896_v21, %v845_v52 }
0x10dd   :  { %v902_v20 = vpop.permute.xlu2 %901 }
0x10de   :  { %v904_v22 = vmul.f32 %v902_v20, %v896_v21 }
0x10e0   :  { %906 = vrot.lane.b32.xlu0 %v904_v22, %s1622_s10 }
0x1152   :  { %v907_v24 = vpop.permute.xlu0 %906 }
0x1153   :  { %v909_v25 = vadd.f32 %v907_v24, %v899_v23  ;;  %v773_v24 = vpop.f32.mrf.mxu3 }
0x1155   :  { %1480 = vtanh.f32 %v909_v25 }
0x115b   :  { %v1481_v26 = vpop.eup %1480 }
0x115c   :  { %912 = vrot.lane.b32.xlu1 %v1481_v26, %s1622_s10 }
0x11ce   :  { %v913_v27 = vpop.permute.xlu1 %912 }
0x11cf   :  { %v915_v28 = vmul.f32 %v913_v27, %v896_v21 }
0x11d1   :  { %918 = vrot.lane.b32.xlu2 %v915_v28, %s1623_s11 }
0x122b   :  { %v919_v29 = vpop.permute.xlu2 %918 }
0x122c   :  { %1386 = vmatmul.msk.f32.vlgmr.msra.gmra.mxu1 %vm157_vm5, %v919_v29 }
0x122d   :  { %1190 = vmatpush.msra.mxu1 %v1838_v63 }
0x122f   :  { %1191 = vmatpush.msra.mxu1 %v1840_v2 }
0x1231   :  { %1192 = vmatpush.msra.mxu1 %v1844_v3 }
0x1233   :  { %1193 = vmatpush.msra.mxu1 %v1848_v8 }
0x12a9   :  { %v939_v32 = vpop.f32.mrf.mxu1 }
0x12aa   :  { %v942_v33 = vadd.f32 %v939_v32, %v768_v31 }
0x12ac   :  { %1482 = vtanh.f32 %v942_v33  ;;  %v1387_v35 = vmul.f32 -1.442695, %v942_v33 }
0x12ae   :  { %1484 = vpow2.f32 %v1387_v35 }
0x12b2   :  { %v1483_v34 = vpop.eup %1482 }
0x12b3   :  { %965 = vrot.lane.b32.xlu0 %v1483_v34, %s1622_s10 }
0x12b4   :  { %v1485_v36 = vpop.eup %1484 }
0x12b5   :  { %v946_v38 = vadd.f32 1.0, %v1485_v36 }
0x12b7   :  { %1486 = vrcp.f32 %v946_v38  ;;  %v958_v44 = vand.u32 2147483648, %v946_v38  ;;  %vm952_vm9 = vweird.f32 %v946_v38  ;;  %v956_v45 = vand.u32 2147483647, %v946_v38 }
0x12b9   :  { %v959_v47 = vor.u32 1.1754944e-38, %v958_v44  ;;  %vm957_vm11 = vcmp.eq.f32.partialorder %v956_v45, 8.507059e+37 }
0x12bd   :  { %v1487_v39 = vpop.eup %1486 }
0x12be   :  { %v948_v40 = vmul.f32 %v1487_v39, %v946_v38  ;;  %vm953_vm8 = vweird.f32 %v1487_v39 }
0x12bf   :  { %vm954_vm10 = vmor %vm952_vm9, %vm953_vm8 }
0x12c0   :  { %v949_v41 = vsub.f32 1.0, %v948_v40 }
0x12c2   :  { %v950_v42 = vmul.f32 %v1487_v39, %v949_v41 }
0x12c4   :  { %v951_v43 = vadd.f32 %v1487_v39, %v950_v42 }
0x12c6   :  { %v955_v46 = vsel %vm954_vm10, %v1487_v39, %v951_v43 }
0x12c7   :  { %v960_v50 = vsel %vm957_vm11, %v959_v47, %v955_v46 }
0x12c8   :  { %v963_v52 = vmul.f32 %v960_v50, %v909_v25  ;;  %v774_v25 = vadd.f32 %v1871_v14, %v773_v24 }
0x1325   :  { %v966_v49 = vpop.permute.xlu0 %965 }
0x1326   :  { %v968_v51 = vmul.f32 %v966_v49, %v960_v50 }
0x1328   :  { %970 = vrot.lane.b32.xlu1 %v968_v51, %s1622_s10 }
0x139a   :  { %v971_v53 = vpop.permute.xlu1 %970 }
0x139b   :  { %v973_v54 = vadd.f32 %v971_v53, %v963_v52  ;;  %v776_v53 = vpop.f32.mrf.mxu3 }
0x139d   :  { %1488 = vtanh.f32 %v973_v54 }
0x13a3   :  { %v1489_v55 = vpop.eup %1488 }
0x13a4   :  { %976 = vrot.lane.b32.xlu2 %v1489_v55, %s1622_s10 }
0x13fe   :  { %v977_v56 = vpop.permute.xlu2 %976 }
0x13ff   :  { %v979_v57 = vmul.f32 %v977_v56, %v960_v50 }
0x1401   :  { %982 = vrot.lane.b32.xlu0 %v979_v57, %s1623_s11 }
0x1473   :  { %v983_v58 = vpop.permute.xlu0 %982 }
0x1474   :  { %1388 = vmatmul.msk.f32.vlgmr.msrb.gmra.mxu2 %vm157_vm5, %v983_v58 }
0x1475   :  { %1254 = vmatpush.msrb.mxu2 %v1838_v63 }
0x1477   :  { %1255 = vmatpush.msrb.mxu2 %v1840_v2 }
0x1479   :  { %1256 = vmatpush.msrb.mxu2 %v1844_v3 }
0x147b   :  { %1257 = vmatpush.msrb.mxu2 %v1848_v8 }
0x14f7   :  { %v1003_v62 = vpop.f32.mrf.mxu2 }
0x14f8   :  { %v1006_v9 = vadd.f32 %v1003_v62, %v771_v60 }
0x14fa   :  { %1490 = vtanh.f32 %v1006_v9  ;;  %v1389_v11 = vmul.f32 -1.442695, %v1006_v9 }
0x14fc   :  { %1492 = vpow2.f32 %v1389_v11 }
0x1500   :  { %v1491_v10 = vpop.eup %1490 }
0x1501   :  { %1029 = vrot.lane.b32.xlu1 %v1491_v10, %s1622_s10 }
0x1502   :  { %v1493_v12 = vpop.eup %1492 }
0x1503   :  { %v1010_v13 = vadd.f32 1.0, %v1493_v12 }
0x1505   :  { %1494 = vrcp.f32 %v1010_v13  ;;  %v1022_v8 = vand.u32 2147483648, %v1010_v13  ;;  %vm1016_vm13 = vweird.f32 %v1010_v13  ;;  %v1020_v16 = vand.u32 2147483647, %v1010_v13 }
0x1507   :  { %v1023_v0 = vor.u32 1.1754944e-38, %v1022_v8  ;;  %vm1021_vm15 = vcmp.eq.f32.partialorder %v1020_v16, 8.507059e+37 }
0x150b   :  { %v1495_v63 = vpop.eup %1494 }
0x150c   :  { %v1012_v2 = vmul.f32 %v1495_v63, %v1010_v13  ;;  %vm1017_vm12 = vweird.f32 %v1495_v63 }
0x150d   :  { %vm1018_vm14 = vmor %vm1016_vm13, %vm1017_vm12 }
0x150e   :  { %v1013_v6 = vsub.f32 1.0, %v1012_v2 }
0x1510   :  { %v1014_v3 = vmul.f32 %v1495_v63, %v1013_v6  ;;  %v1538_v6 = vld [vmem:[%s1975_s3] ss:$0 sm:$0xff] }
0x1512   :  { %v1015_v15 = vadd.f32 %v1495_v63, %v1014_v3  ;;  %v146_v3 = vadd.f32 %v1538_v6, %v1828_v37 }
0x1514   :  { %v1019_v17 = vsel %vm1018_vm14, %v1495_v63, %v1015_v15  ;;  %v656_v8 = vadd.f32 %v1898_v61, %v146_v3 }
0x1515   :  { %v1024_v7 = vsel %vm1021_vm15, %v1023_v0, %v1019_v17 }
0x1516   :  { %v1027_v18 = vmul.f32 %v1024_v7, %v973_v54  ;;  %v777_v54 = vadd.f32 %v1871_v14, %v776_v53 }
0x1573   :  { %v1030_v1 = vpop.permute.xlu1 %1029 }
0x1574   :  { %v1032_v4 = vmul.f32 %v1030_v1, %v1024_v7 }
0x1576   :  { %1034 = vrot.lane.b32.xlu2 %v1032_v4, %s1622_s10 }
0x15d0   :  { %v1035_v19 = vpop.permute.xlu2 %1034 }
0x15d1   :  { %v1037_v5 = vadd.f32 %v1035_v19, %v1027_v18  ;;  %v1374_v19 = vmul.f32 -1.442695, %v656_v8 }
0x15d3   :  { %1496 = vtanh.f32 %v1037_v5 }
0x15d9   :  { %v1497_v20 = vpop.eup %1496 }
0x15da   :  { %1040 = vrot.lane.b32.xlu0 %v1497_v20, %s1622_s10 }
0x164c   :  { %v1041_v21 = vpop.permute.xlu0 %1040 }
0x164d   :  { %v1043_v22 = vmul.f32 %v1041_v21, %v1024_v7 }
0x164f   :  { %1046 = vrot.lane.b32.xlu1 %v1043_v22, %s1623_s11 }
0x16c1   :  { %v1047_v23 = vpop.permute.xlu1 %1046 }
0x16c2   :  { %1390 = vmatmul.msk.f32.vlgmr.msrb.gmra.mxu1 %vm157_vm5, %v1047_v23 }
0x173f   :  { %v1067_v26 = vpop.f32.mrf.mxu1 }
0x1740   :  { %v1070_v27 = vadd.f32 %v1067_v26, %v774_v25 }
0x1742   :  { %1498 = vtanh.f32 %v1070_v27  ;;  %v1391_v29 = vmul.f32 -1.442695, %v1070_v27 }
0x1744   :  { %1500 = vpow2.f32 %v1391_v29 }
0x1748   :  { %v1499_v28 = vpop.eup %1498 }
0x1749   :  { %1093 = vrot.lane.b32.xlu2 %v1499_v28, %s1622_s10 }
0x174a   :  { %v1501_v30 = vpop.eup %1500 }
0x174b   :  { %v1074_v31 = vadd.f32 1.0, %v1501_v30 }
0x174d   :  { %1502 = vrcp.f32 %v1074_v31  ;;  %v1086_v38 = vand.u32 2147483648, %v1074_v31  ;;  %vm1080_vm2 = vweird.f32 %v1074_v31  ;;  %v1084_v39 = vand.u32 2147483647, %v1074_v31 }
0x174f   :  { %v1087_v41 = vor.u32 1.1754944e-38, %v1086_v38  ;;  %vm1085_vm4 = vcmp.eq.f32.partialorder %v1084_v39, 8.507059e+37 }
0x1753   :  { %v1503_v32 = vpop.eup %1502 }
0x1754   :  { %v1076_v33 = vmul.f32 %v1503_v32, %v1074_v31  ;;  %vm1081_vm1 = vweird.f32 %v1503_v32 }
0x1755   :  { %vm1082_vm3 = vmor %vm1080_vm2, %vm1081_vm1 }
0x1756   :  { %v1077_v34 = vsub.f32 1.0, %v1076_v33 }
0x1758   :  { %v1078_v35 = vmul.f32 %v1503_v32, %v1077_v34 }
0x175a   :  { %v1079_v36 = vadd.f32 %v1503_v32, %v1078_v35  ;;  %v779_v35 = vpop.f32.mrf.mxu3 }
0x175c   :  { %v1083_v40 = vsel %vm1082_vm3, %v1503_v32, %v1079_v36  ;;  %v780_v36 = vadd.f32 %v1871_v14, %v779_v35 }
0x175d   :  { %v1088_v43 = vsel %vm1085_vm4, %v1087_v41, %v1083_v40 }
0x175e   :  { %v1091_v45 = vmul.f32 %v1088_v43, %v1037_v5 }
0x17a3   :  { %v1094_v42 = vpop.permute.xlu2 %1093 }
0x17a4   :  { %v1096_v44 = vmul.f32 %v1094_v42, %v1088_v43 }
0x17a6   :  { %1098 = vrot.lane.b32.xlu0 %v1096_v44, %s1622_s10 }
0x1818   :  { %v1099_v46 = vpop.permute.xlu0 %1098 }
0x1819   :  { %v1101_v47 = vadd.f32 %v1099_v46, %v1091_v45 }
0x181b   :  { %1504 = vtanh.f32 %v1101_v47 }
0x1821   :  { %v1505_v49 = vpop.eup %1504 }
0x1822   :  { %1104 = vrot.lane.b32.xlu1 %v1505_v49, %s1622_s10 }
0x1894   :  { %v1105_v50 = vpop.permute.xlu1 %1104 }
0x1895   :  { %v1107_v51 = vmul.f32 %v1105_v50, %v1088_v43 }
0x1897   :  { %1110 = vrot.lane.b32.xlu2 %v1107_v51, %s1623_s11 }
0x18f1   :  { %v1111_v52 = vpop.permute.xlu2 %1110 }
0x18f2   :  { %1392 = vmatmul.msk.f32.vlgmr.msra.gmra.mxu2 %vm157_vm5, %v1111_v52 }
0x1975   :  { %v1131_v55 = vpop.f32.mrf.mxu2 }
0x1976   :  { %v1134_v56 = vadd.f32 %v1131_v55, %v777_v54 }
0x1978   :  { %1506 = vtanh.f32 %v1134_v56  ;;  %v1393_v58 = vmul.f32 -1.442695, %v1134_v56 }
0x197a   :  { %1508 = vpow2.f32 %v1393_v58 }
0x197e   :  { %v1507_v57 = vpop.eup %1506 }
0x197f   :  { %1157 = vrot.lane.b32.xlu0 %v1507_v57, %s1622_s10 }
0x1980   :  { %v1509_v59 = vpop.eup %1508 }
0x1981   :  { %v1138_v60 = vadd.f32 1.0, %v1509_v59 }
0x1983   :  { %1510 = vrcp.f32 %v1138_v60  ;;  %v1150_v13 = vand.u32 2147483648, %v1138_v60  ;;  %vm1144_vm7 = vweird.f32 %v1138_v60  ;;  %v1148_v63 = vand.u32 2147483647, %v1138_v60 }
0x1984   :  { %1512 = vtanh.f32 %v656_v8 }
0x1985   :  { %v1151_v15 = vor.u32 1.1754944e-38, %v1150_v13  ;;  %vm1149_vm8 = vcmp.eq.f32.partialorder %v1148_v63, 8.507059e+37 }
0x1989   :  { %v1511_v62 = vpop.eup %1510 }
0x198a   :  { %v1140_v9 = vmul.f32 %v1511_v62, %v1138_v60  ;;  %vm1145_vm6 = vweird.f32 %v1511_v62  ;;  %v1513_v1 = vpop.eup %1512 }
0x198b   :  { %vm1146_vm0 = vmor %vm1144_vm7, %vm1145_vm6 }
0x198c   :  { %v1141_v10 = vsub.f32 1.0, %v1140_v9 }
0x198e   :  { %v1142_v11 = vmul.f32 %v1511_v62, %v1141_v10 }
0x1990   :  { %v1143_v12 = vadd.f32 %v1511_v62, %v1142_v11 }
0x1992   :  { %v1147_v2 = vsel %vm1146_vm0, %v1511_v62, %v1143_v12 }
0x1993   :  { %v1152_v17 = vsel %vm1149_vm8, %v1151_v15, %v1147_v2 }
0x1994   :  { %v1155_v7 = vmul.f32 %v1152_v17, %v1101_v47 }
0x19f1   :  { %v1158_v16 = vpop.permute.xlu0 %1157 }
0x19f2   :  { %v1160_v0 = vmul.f32 %v1158_v16, %v1152_v17 }
0x19f4   :  { %1162 = vrot.lane.b32.xlu1 %v1160_v0, %s1622_s10 }
0x19fc   :  { %679 = vrot.lane.b32.xlu1 %v1513_v1, %s1622_s10 }
0x1a66   :  { %v1163_v4 = vpop.permute.xlu1 %1162 }
0x1a67   :  { %v1941_v18 = vadd.f32 %v1163_v4, %v1155_v7 }
0x1a69   :  { %1514 = vtanh.f32 %v1941_v18 }
0x1a6a   :  { %1516 = vpow2.f32 %v1374_v19 }
0x1a6e   :  { %v680_v31 = vpop.permute.xlu1 %679 }
0x1a6f   :  { %v1515_v37 = vpop.eup %1514 }
0x1a70   :  { %1168 = vrot.lane.b32.xlu2 %v1515_v37, %s1622_s10  ;;  %v1517_v61 = vpop.eup %1516 }
0x1a71   :  { %v660_v5 = vadd.f32 1.0, %v1517_v61 }
0x1a73   :  { %1518 = vrcp.f32 %v660_v5  ;;  %v672_v27 = vand.u32 2147483648, %v660_v5  ;;  %vm666_vm10 = vweird.f32 %v660_v5  ;;  %v670_v28 = vand.u32 2147483647, %v660_v5 }
0x1a75   :  { %v673_v30 = vor.u32 1.1754944e-38, %v672_v27  ;;  %vm671_vm12 = vcmp.eq.f32.partialorder %v670_v28, 8.507059e+37 }
0x1a79   :  { %v1519_v20 = vpop.eup %1518 }
0x1a7a   :  { %v662_v21 = vmul.f32 %v1519_v20, %v660_v5  ;;  %vm667_vm9 = vweird.f32 %v1519_v20 }
0x1a7b   :  { %vm668_vm11 = vmor %vm666_vm10, %vm667_vm9 }
0x1a7c   :  { %v663_v22 = vsub.f32 1.0, %v662_v21 }
0x1a7e   :  { %v664_v23 = vmul.f32 %v1519_v20, %v663_v22 }
0x1a80   :  { %v665_v25 = vadd.f32 %v1519_v20, %v664_v23 }
0x1a82   :  { %v669_v29 = vsel %vm668_vm11, %v1519_v20, %v665_v25 }
0x1a83   :  { %v674_v32 = vsel %vm671_vm12, %v673_v30, %v669_v29  ;;  %v1303_v30 = vld [vmem:[#allocation7 + $0x18] sm:$0xff] }
0x1a84   :  { %v682_v33 = vmul.f32 %v680_v31, %v674_v32  ;;  %v677_v41 = vmul.f32 %v674_v32, %v1879_v48  ;;  %v1302_v31 = vld [vmem:[#allocation7 + $0x10] sm:$0xff]  ;;  %1325 = vmatpush.msrb.mxu1 %v1303_v30 }
0x1a86   :  { %1326 = vmatpush.msrb.mxu1 %v1302_v31 }
0x1aca   :  { %v1169_v24 = vpop.permute.xlu2 %1168 }
0x1acb   :  { %v1171_v26 = vmul.f32 %v1169_v24, %v1152_v17 }
0x1acd   :  { %1174 = vrot.lane.b32.xlu0 %v1171_v26, %s1623_s11 }
0x1ad5   :  { %684 = vrot.lane.b32.xlu0 %v682_v33, %s1622_s10  ;;  %v1300_v33 = vld [vmem:[#allocation7] sm:$0xff] }
0x1b3f   :  { %v1175_v34 = vpop.permute.xlu0 %1174 }
0x1b40   :  { %1394 = vmatmul.msk.f32.vlgmr.msra.gmra.mxu1 %vm157_vm5, %v1175_v34 }
0x1b47   :  { %v685_v40 = vpop.permute.xlu0 %684 }
0x1b48   :  { %v687_v42 = vadd.f32 %v685_v40, %v677_v41 }
0x1bbd   :  { %v1195_v38 = vpop.f32.mrf.mxu1 }
0x1bbe   :  { %v1198_v39 = vadd.f32 %v1195_v38, %v780_v36  ;;  %v1409_v38 = vld [vmem:[%s1980_s8] ss:$0 sm:$0xff] }
0x1bc0   :  { %1520 = vtanh.f32 %v1198_v39  ;;  %v1395_v45 = vmul.f32 -1.442695, %v1198_v39 }
0x1bc1   :  { %1522 = vtanh.f32 %v687_v42 }
0x1bc2   :  { %1524 = vpow2.f32 %v1395_v45 }
0x1bc6   :  { %v1521_v43 = vpop.eup %1520 }
0x1bc7   :  { %1221 = vrot.lane.b32.xlu2 %v1521_v43, %s1622_s10  ;;  %v1523_v44 = vpop.eup %1522 }
0x1bc8   :  { %v1525_v46 = vpop.eup %1524 }
0x1bc9   :  { %v1202_v47 = vadd.f32 1.0, %v1525_v46 }
0x1bcb   :  { %1526 = vrcp.f32 %v1202_v47  ;;  %v1214_v48 = vand.u32 2147483648, %v1202_v47  ;;  %vm1208_vm14 = vweird.f32 %v1202_v47  ;;  %v1212_v54 = vand.u32 2147483647, %v1202_v47 }
0x1bcd   :  { %v1215_v56 = vor.u32 1.1754944e-38, %v1214_v48  ;;  %vm1213_vm1 = vcmp.eq.f32.partialorder %v1212_v54, 8.507059e+37 }
0x1bcf   :  { %690 = vrot.lane.b32.xlu2 %v1523_v44, %s1622_s10 }
0x1bd1   :  { %v1527_v49 = vpop.eup %1526 }
0x1bd2   :  { %v1204_v50 = vmul.f32 %v1527_v49, %v1202_v47  ;;  %vm1209_vm13 = vweird.f32 %v1527_v49 }
0x1bd3   :  { %vm1210_vm15 = vmor %vm1208_vm14, %vm1209_vm13 }
0x1bd4   :  { %v1205_v51 = vsub.f32 1.0, %v1204_v50 }
0x1bd6   :  { %v1206_v52 = vmul.f32 %v1527_v49, %v1205_v51 }
0x1bd8   :  { %v1207_v53 = vadd.f32 %v1527_v49, %v1206_v52 }
0x1bda   :  { %v1211_v55 = vsel %vm1210_vm15, %v1527_v49, %v1207_v53 }
0x1bdb   :  { %v1216_v58 = vsel %vm1213_vm1, %v1215_v56, %v1211_v55 }
0x1bdc   :  { %v1219_v9 = vmul.f32 %v1216_v58, %v1941_v18 }
0x1c21   :  { %v1222_v57 = vpop.permute.xlu2 %1221 }
0x1c22   :  { %v1224_v59 = vmul.f32 %v1222_v57, %v1216_v58 }
0x1c24   :  { %1226 = vrot.lane.b32.xlu1 %v1224_v59, %s1622_s10 }
0x1c29   :  { %v691_v60 = vpop.permute.xlu2 %690 }
0x1c2a   :  { %v693_v62 = vmul.f32 %v691_v60, %v674_v32  ;;  %v1301_v32 = vld [vmem:[#allocation7 + $0x8] sm:$0xff] }
0x1c2b   :  { %1327 = vmatpush.msrb.mxu1 %v1301_v32 }
0x1c2c   :  { %695 = vrot.lane.b32.xlu1 %v693_v62, %s1623_s11 }
0x1c2d   :  { %1328 = vmatpush.msrb.mxu1 %v1300_v33 }
0x1c96   :  { %v1227_v10 = vpop.permute.xlu1 %1226 }
0x1c97   :  { %v1229_v11 = vadd.f32 %v1227_v10, %v1219_v9 }
0x1c99   :  { %1528 = vtanh.f32 %v1229_v11 }
0x1c9e   :  { %v696_v12 = vpop.permute.xlu1 %695 }
0x1c9f   :  { %v1529_v13 = vpop.eup %1528  ;;  %699 = vst.msk [vmem:[#allocation3 + $0x38] sm:$0xff] %vm157_vm5, %v696_v12 }
0x1ca0   :  { %1232 = vrot.lane.b32.xlu0 %v1529_v13, %s1622_s10 }
0x1ca6   :  { %v716_v63 = vld [vmem:[#allocation3 + $0x38] sm:$0xff] }
0x1ca7   :  { %1382 = vmatmul.msk.f32.gmra.mxu3 %vm157_vm5, %v716_v63 }
0x1d12   :  { %v1233_v2 = vpop.permute.xlu0 %1232 }
0x1d13   :  { %v1235_v6 = vmul.f32 %v1233_v2, %v1216_v58 }
0x1d15   :  { %1238 = vrot.lane.b32.xlu2 %v1235_v6, %s1623_s11 }
0x1d2a   :  { %v782_v15 = vpop.f32.mrf.mxu3 }
0x1d2b   :  { %v783_v8 = vadd.f32 %v1871_v14, %v782_v15 }
0x1d6f   :  { %v1239_v3 = vpop.permute.xlu2 %1238 }
0x1d70   :  { %1396 = vmatmul.msk.f32.vlgmr.msrb.gmra.mxu2 %vm157_vm5, %v1239_v3 }
0x1df3   :  { %v1259_v16 = vpop.f32.mrf.mxu2 }
0x1df4   :  { %v1262_v17 = vadd.f32 %v1259_v16, %v783_v8 }
0x1df6   :  { %1530 = vtanh.f32 %v1262_v17  ;;  %v1397_v1 = vmul.f32 -1.442695, %v1262_v17 }
0x1df8   :  { %1532 = vpow2.f32 %v1397_v1 }
0x1dfc   :  { %v1531_v0 = vpop.eup %1530 }
0x1dfd   :  { %1285 = vrot.lane.b32.xlu0 %v1531_v0, %s1622_s10 }
0x1dfe   :  { %v1533_v7 = vpop.eup %1532 }
0x1dff   :  { %v1266_v4 = vadd.f32 1.0, %v1533_v7 }
0x1e01   :  { %1534 = vrcp.f32 %v1266_v4  ;;  %v1278_v20 = vand.u32 2147483648, %v1266_v4  ;;  %vm1272_vm3 = vweird.f32 %v1266_v4  ;;  %v1276_v14 = vand.u32 2147483647, %v1266_v4 }
0x1e03   :  { %v1279_v22 = vor.u32 1.1754944e-38, %v1278_v20  ;;  %vm1277_vm6 = vcmp.eq.f32.partialorder %v1276_v14, 8.507059e+37 }
0x1e07   :  { %v1535_v18 = vpop.eup %1534 }
0x1e08   :  { %v1268_v37 = vmul.f32 %v1535_v18, %v1266_v4  ;;  %vm1273_vm2 = vweird.f32 %v1535_v18 }
0x1e09   :  { %vm1274_vm4 = vmor %vm1272_vm3, %vm1273_vm2 }
0x1e0a   :  { %v1269_v19 = vsub.f32 1.0, %v1268_v37 }
0x1e0c   :  { %v1270_v61 = vmul.f32 %v1535_v18, %v1269_v19 }
0x1e0e   :  { %v1271_v5 = vadd.f32 %v1535_v18, %v1270_v61 }
0x1e10   :  { %v1275_v21 = vsel %vm1274_vm4, %v1535_v18, %v1271_v5 }
0x1e11   :  { %v1280_v24 = vsel %vm1277_vm6, %v1279_v22, %v1275_v21 }
0x1e12   :  { %v1283_v26 = vmul.f32 %v1280_v24, %v1229_v11 }
0x1e6f   :  { %v1286_v23 = vpop.permute.xlu0 %1285 }
0x1e70   :  { %v1288_v25 = vmul.f32 %v1286_v23, %v1280_v24 }
0x1e72   :  { %1290 = vrot.lane.b32.xlu1 %v1288_v25, %s1622_s10 }
0x1ee4   :  { %v1291_v27 = vpop.permute.xlu1 %1290 }
0x1ee5   :  { %v1293_v28 = vadd.f32 %v1291_v27, %v1283_v26 }
0x1ee7   :  { %1536 = vtanh.f32 %v1293_v28 }
0x1eed   :  { %v1537_v29 = vpop.eup %1536 }
0x1eee   :  { %1296 = vrot.lane.b32.xlu2 %v1537_v29, %s1622_s10  ;;  %s1624_s10 = smov [#allocation9]  }
0x1eef   :  { %s1339_s13 = sshll.u32 %s1624_s10, 4  ;;  %s1340_s13 = int_to_ptr.vmem [resolvable:$true] %s1339_s13 }
0x1f48   :  { %v1297_v34 = vpop.permute.xlu2 %1296 }
0x1f49   :  { %v1299_v35 = vmul.f32 %v1297_v34, %v1280_v24 }
0x1f4b   :  { %1309 = vrot.lane.b32.xlu0 %v1299_v35, %s1623_s11 }
0x1fbd   :  { %v1310_v36 = vpop.permute.xlu0 %1309 }
0x1fbe   :  { %1398 = vmatmul.msk.f32.vlgmr.msrb.gmra.mxu1 %vm157_vm5, %v1310_v36 }
0x203b   :  { %v1330_v39 = vpop.f32.mrf.mxu1 }
0x203c   :  { %v1331_v40 = vadd.f32 %v1409_v38, %v1330_v39 }
0x203e   :  { %1333 = vst [vmem:[#allocation9] sm:$0xff] %v1331_v40 }
0x203f   :  { %1344 = dma.vmem_to_hbm [thread:$0]  %s1340_s13, 128, %s1342_s16, [#allocation6]  }
0x2040   :  { %1615 = dma.done.wait [#allocation6], 128  }
0x2041   :  { %1616 = vsyncadd [#allocation6], 4294967168 }
0x2042   :  { %1349 = vsyncpa [#allocation5], 1 }
0x2043   :  { %1350 = vsyncpa [#allocation8], 1 }
0x2044   :  { %1351 = vsyncpa [#allocation6], 1 }

</bundles_post_ra>
